<compile_context>
chip_gen: v6e
topology: v6e:2x2x1
jax: 0.10.0
libtpu: 0.0.40
codegen_flags: <defaults>
</compile_context>

<pallas_src>
import functools

import jax
import jax.numpy as jnp
from jax.experimental import pallas as pl
from jax.experimental.pallas import tpu as pltpu


_LEAKY_SLOPE = 0.01  # F.leaky_relu default negative_slope


def _gcn_kernel(src_ref, nbr_ref, w_self_ref, w_agg_ref, b_ref, out_ref):
    # Two MXU matmuls, f32 accumulation.  The neighbor mean is already folded
    # into w_agg_ref (replicated K times and scaled by 1/K on the host), so
    # dot(nbr_flat, w_agg_rep) == mean_k(nbr) @ W_agg with f32 accumulation.
    h = jnp.dot(src_ref[...], w_self_ref[...],
                preferred_element_type=jnp.float32)              # (tn, H) f32
    h = h + jnp.dot(nbr_ref[...], w_agg_ref[...],
                    preferred_element_type=jnp.float32)          # (tn, H) f32
    h = h + b_ref[...]                                           # bias is f32 (1, H)
    # leaky_relu, slope 0.01
    out_ref[...] = jnp.where(h >= 0, h, _LEAKY_SLOPE * h).astype(out_ref.dtype)


def _round_up(x, m):
    return ((x + m - 1) // m) * m


def _cdiv(a, b):
    return -(-a // b)


def _vmem_capacity_bytes():
    try:
        return int(pltpu.get_tpu_info().vmem_capacity_bytes)
    except Exception:
        return 64 * 1024 * 1024  # conservative (v7x per-TC) fallback


def _num_tensorcores():
    """Best-effort TensorCore-per-chip count; defaults to 1 (v5e/v6e)."""
    try:
        info = pltpu.get_tpu_info()
    except Exception:
        return 1
    for attr in ("num_cores", "core_count", "num_tensorcores", "tensorcore_count"):
        v = getattr(info, attr, None)
        if isinstance(v, int) and v > 0:
            return v
    cv = getattr(info, "chip_version", None)
    if cv is not None and "7" in str(cv):
        return 2
    return 1


def _choose_tile_n(N, K, D_in, H, comp_itemsize, out_itemsize, vmem_budget,
                   neighbor_buffers, num_tc, max_tile=512):
    """Largest multiple-of-8 node tile whose pipelined footprint fits."""
    # Streamed per-row bytes: neighbor stream uses `neighbor_buffers` buffers,
    # src and output use the default 2.
    per_row = ((neighbor_buffers * K * D_in + 2 * D_in) * comp_itemsize
               + 2 * H * out_itemsize)
    # Resident (grid-invariant) operands: fused-in weights + f32 bias,
    # double-buffered by BlockSpec even though they only DMA once.
    resident = 2 * ((D_in + K * D_in) * H * comp_itemsize + H * 4)
    avail = max(vmem_budget - resident, per_row * 8)
    tile = avail // per_row
    tile = min(tile, max_tile, _round_up(N, 8))
    if num_tc >= 2:
        # Multi-TC (v7x): target >= 2 steps per core (>= 4 total) when N
        # allows, so each core keeps prefetch/writeback overlap.
        min_steps = 2 * num_tc
        if N >= 8 * min_steps:
            tile = min(tile, _round_up(_cdiv(N, min_steps), 8))
    return int(max(8, (tile // 8) * 8))


@functools.partial(
    jax.jit,
    static_argnames=("tile_n", "vmem_limit_bytes", "neighbor_buffers", "out_dtype"),
)
def _gcn_layer_call(src, nbr_flat, w_self, w_agg_rep, bias2d, *, tile_n,
                    vmem_limit_bytes, neighbor_buffers, out_dtype):
    N, D_in = src.shape
    KD = nbr_flat.shape[1]
    H = w_self.shape[1]

    nbr_kwargs = {}
    if neighbor_buffers > 2:
        nbr_kwargs["pipeline_mode"] = pl.Buffered(neighbor_buffers)

    return pl.pallas_call(
        _gcn_kernel,
        out_shape=jax.ShapeDtypeStruct((N, H), out_dtype),
        grid_spec=pltpu.PrefetchScalarGridSpec(
            num_scalar_prefetch=0,
            grid=(N // tile_n,),
            in_specs=[
                pl.BlockSpec((tile_n, D_in), lambda i: (i, 0)),          # src
                pl.BlockSpec((tile_n, KD), lambda i: (i, 0),             # nbrs (lane-dense)
                             **nbr_kwargs),
                pl.BlockSpec((D_in, H), lambda i: (0, 0)),               # W_self
                pl.BlockSpec((KD, H), lambda i: (0, 0)),                 # W_agg replicated /K
                pl.BlockSpec((1, H), lambda i: (0, 0)),                  # bias (f32)
            ],
            out_specs=pl.BlockSpec((tile_n, H), lambda i: (i, 0)),
        ),
        compiler_params=pltpu.CompilerParams(
            dimension_semantics=("parallel",),
            vmem_limit_bytes=vmem_limit_bytes,
        ),
    )(src, nbr_flat, w_self, w_agg_rep, bias2d)


def gcn_layer(src_features, neighbor_features, w_self, w_agg, b_agg, *,
              compute_dtype=jnp.bfloat16, tile_n=None, neighbor_buffers=2):
    """GCNLayer forward.  Works for any N (node axis is padded internally).

    compute_dtype controls the streamed / MXU-input dtype (bf16 by default —
    halves HBM traffic on this bandwidth-bound kernel); accumulation is always
    f32 and the returned dtype matches src_features.dtype.
    """
    N, D_in = src_features.shape
    N2, K, D_in2 = neighbor_features.shape
    assert N2 == N, "src / neighbor node counts must match"
    assert D_in2 == D_in, "feature dims of src / neighbors must match"
    H = w_self.shape[1]

    out_dtype = jnp.dtype(src_features.dtype)
    compute_dtype = jnp.dtype(compute_dtype)
    cb = compute_dtype.itemsize
    ob = out_dtype.itemsize

    capacity = _vmem_capacity_bytes()
    num_tc = _num_tensorcores()
    budget = int(capacity * 0.45)
    if tile_n is None:
        tile_n = _choose_tile_n(N, K, D_in, H, cb, ob, budget,
                                neighbor_buffers, num_tc)
    else:
        tile_n = int(max(8, (int(tile_n) // 8) * 8))

    # Lane-dense neighbor stream: (N, K, D_in) -> (N, K*D_in), cast to the
    # streaming dtype before padding.
    src_c = src_features.astype(compute_dtype)
    nbr_flat = neighbor_features.reshape(N, K * D_in).astype(compute_dtype)

    # Pad the node axis instead of asserting divisibility; padded rows are
    # zero and sliced off before returning.
    N_pad = _round_up(N, tile_n)
    if N_pad != N:
        pad = N_pad - N
        src_c = jnp.pad(src_c, ((0, pad), (0, 0)))
        nbr_flat = jnp.pad(nbr_flat, ((0, pad), (0, 0)))

    # Fold the 1/K mean into a replicated aggregator weight (built once, in
    # f32, then cast): dot(nbr_flat, W_agg_rep) == mean_k(nbr) @ W_agg.
    w_self_c = w_self.astype(compute_dtype)
    w_agg_rep = (jnp.tile(w_agg.astype(jnp.float32), (K, 1)) / K).astype(compute_dtype)
    bias2d = b_agg.reshape(1, H).astype(jnp.float32)

    footprint = ((neighbor_buffers * tile_n * K * D_in + 2 * tile_n * D_in) * cb
                 + 2 * tile_n * H * ob
                 + 2 * ((D_in + K * D_in) * H * cb + H * 4))
    vmem_limit = int(min(capacity - (8 << 20),
                         max(32 << 20, footprint + (16 << 20))))
    vmem_limit = max(vmem_limit, footprint + (4 << 20))

    out = _gcn_layer_call(
        src_c, nbr_flat, w_self_c, w_agg_rep, bias2d,
        tile_n=tile_n, vmem_limit_bytes=vmem_limit,
        neighbor_buffers=neighbor_buffers, out_dtype=out_dtype,
    )
    return out[:N]


def _xavier_uniform(key, fan_in, fan_out, dtype=jnp.float32):
    # Matches torch.nn.init.xavier_uniform_ for a (fan_in, fan_out) matrix.
    bound = (6.0 / (fan_in + fan_out)) ** 0.5
    return jax.random.uniform(key, (fan_in, fan_out), dtype, -bound, bound)


def gcn_reference(src, nbr, w_self, w_agg, b_agg):
    """Pure-JAX f32 reference matching the PyTorch forward."""
    nbr_msg = jnp.mean(nbr, axis=1)
    neighbor_hidden = nbr_msg @ w_agg + b_agg
    self_hidden = src @ w_self
    h = self_hidden + neighbor_hidden
    return jnp.where(h >= 0, h, _LEAKY_SLOPE * h)


if __name__ == "__main__":
    key = jax.random.PRNGKey(0)
    k_src, k_nbr, k_wself, k_wagg, k_src2, k_nbr2 = jax.random.split(key, 6)

    # Small shapes implied by the forward: N nodes, K sampled neighbors each.
    N, K, D_in, H = 256, 8, 64, 128

    src_features = jax.random.normal(k_src, (N, D_in), jnp.float32)
    neighbor_features = jax.random.normal(k_nbr, (N, K, D_in), jnp.float32)

    # Deterministic parameter init (xavier uniform weights, zero bias),
    # same shapes as the PyTorch module's __init__.
    w_self = _xavier_uniform(k_wself, D_in, H)        # GCNLayer.weight
    w_agg = _xavier_uniform(k_wagg, D_in, H)          # MessagePassing.weight
    b_agg = jnp.zeros((H,), jnp.float32)              # MessagePassing.bias

    ref = gcn_reference(src_features, neighbor_features, w_self, w_agg, b_agg)

    # 1) Exact-semantics path (f32 streaming) -> tight tolerance.
    out_f32 = jax.block_until_ready(
        gcn_layer(src_features, neighbor_features, w_self, w_agg, b_agg,
                  compute_dtype=jnp.float32))
    assert out_f32.shape == (N, H)
    assert jnp.allclose(out_f32, ref, atol=1e-4, rtol=1e-4), "mismatch (f32 path)"

    # 2) Default fast path (bf16 streaming, f32 accumulation) -> bf16-level
    #    tolerance against the f32 reference.
    out_bf16 = jax.block_until_ready(
        gcn_layer(src_features, neighbor_features, w_self, w_agg, b_agg))
    assert out_bf16.shape == (N, H)
    assert out_bf16.dtype == jnp.float32
    assert jnp.allclose(out_bf16, ref, atol=5e-2, rtol=5e-2), "mismatch (bf16 path)"

    # 3) Ragged node count (exercises the padding path), exact f32 path.
    N2 = 200
    src2 = jax.random.normal(k_src2, (N2, D_in), jnp.float32)
    nbr2 = jax.random.normal(k_nbr2, (N2, K, D_in), jnp.float32)
    out2 = jax.block_until_ready(
        gcn_layer(src2, nbr2, w_self, w_agg, b_agg, compute_dtype=jnp.float32))
    ref2 = gcn_reference(src2, nbr2, w_self, w_agg, b_agg)
    assert out2.shape == (N2, H)
    assert jnp.allclose(out2, ref2, atol=1e-4, rtol=1e-4), "mismatch (ragged N)"

    print("KERNEL_OK")
</pallas_src>

<mosaic_0001>
module attributes {stable_mosaic.version = 11 : i64} {
  func.func @_gcn_kernel(%arg0: i32, %arg1: memref<256x64xf32, #tpu.memory_space<vmem>>, %arg2: memref<256x512xf32, #tpu.memory_space<vmem>>, %arg3: memref<64x128xf32, #tpu.memory_space<vmem>>, %arg4: memref<512x128xf32, #tpu.memory_space<vmem>>, %arg5: memref<1x128xf32, #tpu.memory_space<vmem>>, %arg6: memref<256x128xf32, #tpu.memory_space<vmem>>) attributes {dimension_semantics = [#tpu.dimension_semantics<parallel>], iteration_bounds = array<i64: 1>, scalar_prefetch = 0 : i64, scratch_operands = 0 : i64, tpu.core_type = #tpu.core_type<tc>, window_params = [{transform_indices = @transform_0, window_bounds = array<i64: 256, 64>}, {transform_indices = @transform_1, window_bounds = array<i64: 256, 512>}, {pipeline_mode = #tpu.pipeline_mode<synchronous>, transform_indices = @transform_2, window_bounds = array<i64: 64, 128>}, {pipeline_mode = #tpu.pipeline_mode<synchronous>, transform_indices = @transform_3, window_bounds = array<i64: 512, 128>}, {pipeline_mode = #tpu.pipeline_mode<synchronous>, transform_indices = @transform_4, window_bounds = array<i64: 1, 128>}, {transform_indices = @transform_5, window_bounds = array<i64: 256, 128>}]} {
    %c0 = arith.constant 0 : index
    %c0_0 = arith.constant 0 : index
    %0 = vector.load %arg1[%c0, %c0_0] : memref<256x64xf32, #tpu.memory_space<vmem>>, vector<256x64xf32>
    %c0_1 = arith.constant 0 : index
    %c0_2 = arith.constant 0 : index
    %1 = vector.load %arg3[%c0_1, %c0_2] : memref<64x128xf32, #tpu.memory_space<vmem>>, vector<64x128xf32>
    %cst = arith.constant dense<0.000000e+00> : vector<256x128xf32>
    %2 = tpu.matmul %0, %1, %cst {dimension_numbers = #tpu.dot_dimension_numbers<[1], [0], [0], [1], [0, 0, 1, 1], [], []>} : vector<256x64xf32>, vector<64x128xf32>, vector<256x128xf32> -> vector<256x128xf32>
    %c0_3 = arith.constant 0 : index
    %c0_4 = arith.constant 0 : index
    %3 = vector.load %arg2[%c0_3, %c0_4] : memref<256x512xf32, #tpu.memory_space<vmem>>, vector<256x512xf32>
    %c0_5 = arith.constant 0 : index
    %c0_6 = arith.constant 0 : index
    %4 = vector.load %arg4[%c0_5, %c0_6] : memref<512x128xf32, #tpu.memory_space<vmem>>, vector<512x128xf32>
    %cst_7 = arith.constant dense<0.000000e+00> : vector<256x128xf32>
    %5 = tpu.matmul %3, %4, %cst_7 {dimension_numbers = #tpu.dot_dimension_numbers<[1], [0], [0], [1], [0, 0, 1, 1], [], []>} : vector<256x512xf32>, vector<512x128xf32>, vector<256x128xf32> -> vector<256x128xf32>
    %6 = arith.addf %2, %5 : vector<256x128xf32>
    %c0_8 = arith.constant 0 : index
    %c0_9 = arith.constant 0 : index
    %7 = vector.load %arg5[%c0_8, %c0_9] : memref<1x128xf32, #tpu.memory_space<vmem>>, vector<1x128xf32>
    %8 = vector.broadcast %7 : vector<1x128xf32> to vector<256x128xf32>
    %9 = arith.addf %6, %8 : vector<256x128xf32>
    %cst_10 = arith.constant 0.000000e+00 : f32
    %10 = vector.broadcast %cst_10 : f32 to vector<256x128xf32>
    %11 = arith.cmpf oge, %9, %10 : vector<256x128xf32>
    %cst_11 = arith.constant 0.00999999977 : f32
    %12 = vector.broadcast %cst_11 : f32 to vector<256x128xf32>
    %13 = arith.mulf %12, %9 : vector<256x128xf32>
    %14 = arith.select %11, %9, %13 : vector<256x128xi1>, vector<256x128xf32>
    %c0_12 = arith.constant 0 : index
    %c0_13 = arith.constant 0 : index
    %15 = vector.load %arg6[%c0_12, %c0_13] : memref<256x128xf32, #tpu.memory_space<vmem>>, vector<256x128xf32>
    tpu.vector_store %arg6[%c0_12, %c0_13], %14 {strides = array<i32>} : memref<256x128xf32, #tpu.memory_space<vmem>>, vector<256x128xf32>,
    return
  }
  func.func @transform_0(%arg0: i32) -> (i32, i32) {
    %c0_i32 = arith.constant 0 : i32
    %c0_i32_0 = arith.constant 0 : i32
    return %arg0, %c0_i32 : i32, i32
  }
  func.func @transform_1(%arg0: i32) -> (i32, i32) {
    %c0_i32 = arith.constant 0 : i32
    %c0_i32_0 = arith.constant 0 : i32
    return %arg0, %c0_i32 : i32, i32
  }
  func.func @transform_2(%arg0: i32) -> (i32, i32) {
    %c0_i32 = arith.constant 0 : i32
    %c0_i32_0 = arith.constant 0 : i32
    %c0_i32_1 = arith.constant 0 : i32
    return %c0_i32, %c0_i32_0 : i32, i32
  }
  func.func @transform_3(%arg0: i32) -> (i32, i32) {
    %c0_i32 = arith.constant 0 : i32
    %c0_i32_0 = arith.constant 0 : i32
    %c0_i32_1 = arith.constant 0 : i32
    return %c0_i32, %c0_i32_0 : i32, i32
  }
  func.func @transform_4(%arg0: i32) -> (i32, i32) {
    %c0_i32 = arith.constant 0 : i32
    %c0_i32_0 = arith.constant 0 : i32
    %c0_i32_1 = arith.constant 0 : i32
    return %c0_i32, %c0_i32_0 : i32, i32
  }
  func.func @transform_5(%arg0: i32) -> (i32, i32) {
    %c0_i32 = arith.constant 0 : i32
    %c0_i32_0 = arith.constant 0 : i32
    return %arg0, %c0_i32 : i32, i32
  }
}

</mosaic_0001>

<bundles_post_ra>
// kernel: _gcn_layer_call.1
= control target key start
LH: loop header
LB: loop body
LE: loop exit
PB: predicated region body
PF: predicated region fallthrough
CT: control target
= control target key end

     0   :  { %10 = vsyncpa [#allocation3], 0  ;;  %s1855_s0 = inlined_call_operand.vmem [shape: f32[256,64], index: 0, kind: input, shape index: {}]   ;;  %s1856_s1 = inlined_call_operand.hbm [shape: f32[256,512], index: 1, kind: input, shape index: {}]   ;;  %s1857_s2 = inlined_call_operand.vmem [shape: f32[64,128], index: 2, kind: input, shape index: {}]   ;;  %s1858_s3 = inlined_call_operand.hbm [shape: f32[512,128], index: 3, kind: input, shape index: {}]   ;;  %s1859_s4 = inlined_call_operand.vmem [shape: f32[1,128], index: 4, kind: input, shape index: {}]   ;;  %s1860_s5 = inlined_call_operand.hbm [shape: f32[256,128], index: 5, kind: output, shape index: {}]  }
   0x1   :  { %11 = vsyncpa [#allocation6], 0 }
   0x2   :  { %12 = vsyncpa [#allocation4], 0  ;;  %s1465_s18 = smov [#allocation2]  }
   0x3   :  { %s20_s19 = sshll.u32 %s1465_s18, 4  ;;  %s21_s19 = int_to_ptr.vmem [resolvable:$true] %s20_s19 }
   0x4   :  { %s1407_s20 = scalar_lea.vmem %s21_s19, 16384  ;;  %p1412_p1 = scmp.lt.s32.totalorder %s21_s19, %s21_s19 }
   0x5   :  { %p1408_p0 = scmp.ne.s32.totalorder %s21_s19, %s1407_s20  ;;  %p1413_p2 = scmp.lt.s32.totalorder %s1407_s20, %s1407_s20 }
   0x7   :  { %p1414_p3 = por %p1413_p2, %p1412_p1 }
   0x9   :  { %p1415_p4 = pnand %p1414_p3, %p1408_p0 }
   0xb   :  { %1418 = shalt.err (!%p1415_p4)
}
   0xc   :  { %s1466_s21 = smov 512   ;;  %s1467_s22 = smov 32  }
   0xd   :  { %26 = dma.hbm_to_vmem [thread:$0]  %s1856_s1, 16384, %s21_s19, [#allocation3], %s1466_s21, %s1466_s21, %s1467_s22  }
   0xe   :  { %s1468_s25 = smov [#allocation5]  }
   0xf   :  { %s34_s26 = sshll.u32 %s1468_s25, 4  ;;  %s35_s26 = int_to_ptr.vmem [resolvable:$true] %s34_s26 }
  0x10   :  { %s1427_s27 = scalar_lea.vmem %s35_s26, 8192  ;;  %p1432_p6 = scmp.lt.s32.totalorder %s35_s26, %s35_s26 }
  0x11   :  { %p1428_p5 = scmp.ne.s32.totalorder %s35_s26, %s1427_s27  ;;  %p1433_p7 = scmp.lt.s32.totalorder %s1427_s27, %s1427_s27 }
  0x13   :  { %p1434_p8 = por %p1433_p7, %p1432_p6 }
  0x15   :  { %p1435_p9 = pnand %p1434_p8, %p1428_p5 }
  0x17   :  { %1438 = shalt.err (!%p1435_p9)
}
  0x18   :  { %s1469_s28 = smov 128   ;;  %s1470_s29 = smov 8  }
  0x19   :  { %40 = dma.hbm_to_vmem [thread:$0]  %s1858_s3, 8192, %s35_s26, [#allocation6], %s1469_s28, %s1469_s28, %s1470_s29  }
  0x1a   :  { %1459 = dma.done.wait [#allocation3], 16384  }
  0x1b   :  { %1460 = vsyncadd [#allocation3], 4294950912 }
  0x1c   :  { %1461 = dma.done.wait [#allocation6], 8192  }
  0x1d   :  { %1462 = vsyncadd [#allocation6], 4294959104  ;;  %v1471_v0 = vmov 0.0   ;;  %v232_v1 = vld [vmem:[#allocation5 + $0x78] sm:$0xff]  ;;  %v231_v3 = vld [vmem:[#allocation5 + $0x70] sm:$0xff]  ;;  %vm731_vm0 = vcmask 523264  }
  0x1e   :  { %281 = vmatprep.subr.mxu0 %v1471_v0  ;;  %506 = vmatprep.subr.mxu1 %v1471_v0  ;;  %v264_v2 = vld [vmem:[#allocation5 + $0x178] sm:$0xff]  ;;  %v263_v4 = vld [vmem:[#allocation5 + $0x170] sm:$0xff]  ;;  %v230_v5 = vld [vmem:[#allocation5 + $0x68] sm:$0xff] }
  0x1f   :  { %282 = vmatpush1.msra.mxu0 %v232_v1  ;;  %507 = vmatpush1.msra.mxu1 %v264_v2  ;;  %v262_v6 = vld [vmem:[#allocation5 + $0x168] sm:$0xff]  ;;  %v229_v7 = vld [vmem:[#allocation5 + $0x60] sm:$0xff]  ;;  %v228_v9 = vld [vmem:[#allocation5 + $0x58] sm:$0xff] }
  0x20   :  { %283 = vmatprep.subr.mxu0 %v1471_v0  ;;  %508 = vmatprep.subr.mxu1 %v1471_v0  ;;  %v261_v8 = vld [vmem:[#allocation5 + $0x160] sm:$0xff]  ;;  %v260_v10 = vld [vmem:[#allocation5 + $0x158] sm:$0xff]  ;;  %v227_v11 = vld [vmem:[#allocation5 + $0x50] sm:$0xff] }
  0x21   :  { %284 = vmatpush1.msra.mxu0 %v231_v3  ;;  %509 = vmatpush1.msra.mxu1 %v263_v4  ;;  %v259_v12 = vld [vmem:[#allocation5 + $0x150] sm:$0xff]  ;;  %v226_v13 = vld [vmem:[#allocation5 + $0x48] sm:$0xff]  ;;  %v225_v15 = vld [vmem:[#allocation5 + $0x40] sm:$0xff] }
  0x22   :  { %285 = vmatprep.subr.mxu0 %v1471_v0  ;;  %510 = vmatprep.subr.mxu1 %v1471_v0  ;;  %v258_v14 = vld [vmem:[#allocation5 + $0x148] sm:$0xff]  ;;  %v257_v16 = vld [vmem:[#allocation5 + $0x140] sm:$0xff]  ;;  %v224_v17 = vld [vmem:[#allocation5 + $0x38] sm:$0xff] }
  0x23   :  { %286 = vmatpush1.msra.mxu0 %v230_v5  ;;  %511 = vmatpush1.msra.mxu1 %v262_v6  ;;  %v256_v18 = vld [vmem:[#allocation5 + $0x138] sm:$0xff]  ;;  %v223_v19 = vld [vmem:[#allocation5 + $0x30] sm:$0xff]  ;;  %v222_v21 = vld [vmem:[#allocation5 + $0x28] sm:$0xff] }
  0x24   :  { %287 = vmatprep.subr.mxu0 %v1471_v0  ;;  %512 = vmatprep.subr.mxu1 %v1471_v0  ;;  %v255_v20 = vld [vmem:[#allocation5 + $0x130] sm:$0xff]  ;;  %v254_v22 = vld [vmem:[#allocation5 + $0x128] sm:$0xff]  ;;  %v221_v23 = vld [vmem:[#allocation5 + $0x20] sm:$0xff] }
  0x25   :  { %288 = vmatpush1.msra.mxu0 %v229_v7  ;;  %513 = vmatpush1.msra.mxu1 %v261_v8  ;;  %v253_v24 = vld [vmem:[#allocation5 + $0x120] sm:$0xff]  ;;  %v220_v25 = vld [vmem:[#allocation5 + $0x18] sm:$0xff]  ;;  %v219_v27 = vld [vmem:[#allocation5 + $0x10] sm:$0xff] }
  0x26   :  { %289 = vmatprep.subr.mxu0 %v1471_v0  ;;  %514 = vmatprep.subr.mxu1 %v1471_v0  ;;  %v252_v26 = vld [vmem:[#allocation5 + $0x118] sm:$0xff]  ;;  %v251_v28 = vld [vmem:[#allocation5 + $0x110] sm:$0xff]  ;;  %v218_v29 = vld [vmem:[#allocation5 + $0x8] sm:$0xff] }
  0x27   :  { %290 = vmatpush1.msra.mxu0 %v228_v9  ;;  %515 = vmatpush1.msra.mxu1 %v260_v10  ;;  %v250_v30 = vld [vmem:[#allocation5 + $0x108] sm:$0xff]  ;;  %v217_v31 = vld [vmem:[#allocation5] sm:$0xff]  ;;  %v248_v33 = vld [vmem:[#allocation5 + $0xf8] sm:$0xff] }
  0x28   :  { %291 = vmatprep.subr.mxu0 %v1471_v0  ;;  %516 = vmatprep.subr.mxu1 %v1471_v0  ;;  %v249_v32 = vld [vmem:[#allocation5 + $0x100] sm:$0xff]  ;;  %v280_v34 = vld [vmem:[#allocation5 + $0x1f8] sm:$0xff]  ;;  %v247_v35 = vld [vmem:[#allocation5 + $0xf0] sm:$0xff] }
  0x29   :  { %292 = vmatpush1.msra.mxu0 %v227_v11  ;;  %517 = vmatpush1.msra.mxu1 %v259_v12  ;;  %v279_v36 = vld [vmem:[#allocation5 + $0x1f0] sm:$0xff]  ;;  %v246_v37 = vld [vmem:[#allocation5 + $0xe8] sm:$0xff]  ;;  %v245_v39 = vld [vmem:[#allocation5 + $0xe0] sm:$0xff] }
  0x2a   :  { %293 = vmatprep.subr.mxu0 %v1471_v0  ;;  %518 = vmatprep.subr.mxu1 %v1471_v0  ;;  %v278_v38 = vld [vmem:[#allocation5 + $0x1e8] sm:$0xff]  ;;  %v277_v40 = vld [vmem:[#allocation5 + $0x1e0] sm:$0xff]  ;;  %v244_v41 = vld [vmem:[#allocation5 + $0xd8] sm:$0xff] }
  0x2b   :  { %294 = vmatpush1.msra.mxu0 %v226_v13  ;;  %519 = vmatpush1.msra.mxu1 %v258_v14  ;;  %v276_v42 = vld [vmem:[#allocation5 + $0x1d8] sm:$0xff]  ;;  %v243_v43 = vld [vmem:[#allocation5 + $0xd0] sm:$0xff]  ;;  %v242_v45 = vld [vmem:[#allocation5 + $0xc8] sm:$0xff] }
  0x2c   :  { %295 = vmatprep.subr.mxu0 %v1471_v0  ;;  %520 = vmatprep.subr.mxu1 %v1471_v0  ;;  %v275_v44 = vld [vmem:[#allocation5 + $0x1d0] sm:$0xff]  ;;  %v274_v46 = vld [vmem:[#allocation5 + $0x1c8] sm:$0xff]  ;;  %v241_v47 = vld [vmem:[#allocation5 + $0xc0] sm:$0xff] }
  0x2d   :  { %296 = vmatpush1.msra.mxu0 %v225_v15  ;;  %521 = vmatpush1.msra.mxu1 %v257_v16  ;;  %v273_v48 = vld [vmem:[#allocation5 + $0x1c0] sm:$0xff]  ;;  %v240_v49 = vld [vmem:[#allocation5 + $0xb8] sm:$0xff]  ;;  %v239_v51 = vld [vmem:[#allocation5 + $0xb0] sm:$0xff] }
  0x2e   :  { %297 = vmatprep.subr.mxu0 %v1471_v0  ;;  %522 = vmatprep.subr.mxu1 %v1471_v0  ;;  %v272_v50 = vld [vmem:[#allocation5 + $0x1b8] sm:$0xff]  ;;  %v271_v52 = vld [vmem:[#allocation5 + $0x1b0] sm:$0xff]  ;;  %v238_v53 = vld [vmem:[#allocation5 + $0xa8] sm:$0xff] }
  0x2f   :  { %298 = vmatpush1.msra.mxu0 %v224_v17  ;;  %523 = vmatpush1.msra.mxu1 %v256_v18  ;;  %v270_v54 = vld [vmem:[#allocation5 + $0x1a8] sm:$0xff]  ;;  %v237_v55 = vld [vmem:[#allocation5 + $0xa0] sm:$0xff]  ;;  %v236_v57 = vld [vmem:[#allocation5 + $0x98] sm:$0xff] }
  0x30   :  { %299 = vmatprep.subr.mxu0 %v1471_v0  ;;  %524 = vmatprep.subr.mxu1 %v1471_v0  ;;  %v269_v56 = vld [vmem:[#allocation5 + $0x1a0] sm:$0xff]  ;;  %v268_v58 = vld [vmem:[#allocation5 + $0x198] sm:$0xff]  ;;  %v235_v59 = vld [vmem:[#allocation5 + $0x90] sm:$0xff] }
  0x31   :  { %300 = vmatpush1.msra.mxu0 %v223_v19  ;;  %525 = vmatpush1.msra.mxu1 %v255_v20  ;;  %v267_v60 = vld [vmem:[#allocation5 + $0x190] sm:$0xff]  ;;  %v234_v61 = vld [vmem:[#allocation5 + $0x88] sm:$0xff]  ;;  %v233_v63 = vld [vmem:[#allocation5 + $0x80] sm:$0xff] }
  0x32   :  { %301 = vmatprep.subr.mxu0 %v1471_v0  ;;  %526 = vmatprep.subr.mxu1 %v1471_v0  ;;  %v266_v62 = vld [vmem:[#allocation5 + $0x188] sm:$0xff]  ;;  %v265_v2 = vld [vmem:[#allocation5 + $0x180] sm:$0xff]  ;;  %v92_v3 = vld [vmem:[#allocation2 + $0x18] sm:$0xff] }
  0x33   :  { %302 = vmatpush1.msra.mxu0 %v222_v21  ;;  %527 = vmatpush1.msra.mxu1 %v254_v22  ;;  %v90_v1 = vld [vmem:[#allocation2 + $0x8] sm:$0xff]  ;;  %v89_v4 = vld [vmem:[#allocation2] sm:$0xff]  ;;  %v91_v5 = vld [vmem:[#allocation2 + $0x10] sm:$0xff] }
  0x34   :  { %303 = vmatprep.subr.mxu0 %v1471_v0  ;;  %528 = vmatprep.subr.mxu1 %v1471_v0  ;;  %v88_v6 = vld [vmem:[%s1857_s2 + $0x38] sm:$0xff]  ;;  %v94_v7 = vld [vmem:[#allocation2 + $0x28] sm:$0xff]  ;;  %v93_v9 = vld [vmem:[#allocation2 + $0x20] sm:$0xff] }
  0x35   :  { %304 = vmatpush1.msra.mxu0 %v221_v23  ;;  %529 = vmatpush1.msra.mxu1 %v253_v24  ;;  %v96_v8 = vld [vmem:[#allocation2 + $0x38] sm:$0xff]  ;;  %v95_v10 = vld [vmem:[#allocation2 + $0x30] sm:$0xff]  ;;  %v97_v13 = vld [vmem:[#allocation2 + $0x40] sm:$0xff] }
  0x36   :  { %305 = vmatprep.subr.mxu0 %v1471_v0  ;;  %530 = vmatprep.subr.mxu1 %v1471_v0  ;;  %v100_v11 = vld [vmem:[#allocation2 + $0x58] sm:$0xff]  ;;  %v87_v12 = vld [vmem:[%s1857_s2 + $0x30] sm:$0xff]  ;;  %v102_v15 = vld [vmem:[#allocation2 + $0x68] sm:$0xff] }
  0x37   :  { %306 = vmatpush1.msra.mxu0 %v220_v25  ;;  %531 = vmatpush1.msra.mxu1 %v252_v26  ;;  %v99_v14 = vld [vmem:[#allocation2 + $0x50] sm:$0xff]  ;;  %v104_v16 = vld [vmem:[#allocation2 + $0x78] sm:$0xff]  ;;  %v86_v17 = vld [vmem:[%s1857_s2 + $0x28] sm:$0xff] }
  0x38   :  { %307 = vmatprep.subr.mxu0 %v1471_v0  ;;  %532 = vmatprep.subr.mxu1 %v1471_v0  ;;  %v101_v18 = vld [vmem:[#allocation2 + $0x60] sm:$0xff]  ;;  %v103_v19 = vld [vmem:[#allocation2 + $0x70] sm:$0xff]  ;;  %v106_v20 = vld [vmem:[#allocation2 + $0x88] sm:$0xff] }
  0x39   :  { %308 = vmatpush1.msra.mxu0 %v219_v27  ;;  %533 = vmatpush1.msra.mxu1 %v251_v28  ;;  %v108_v21 = vld [vmem:[#allocation2 + $0x98] sm:$0xff]  ;;  %v85_v22 = vld [vmem:[%s1857_s2 + $0x20] sm:$0xff]  ;;  %v107_v24 = vld [vmem:[#allocation2 + $0x90] sm:$0xff] }
  0x3a   :  { %309 = vmatprep.subr.mxu0 %v1471_v0  ;;  %534 = vmatprep.subr.mxu1 %v1471_v0  ;;  %v105_v23 = vld [vmem:[#allocation2 + $0x80] sm:$0xff]  ;;  %v110_v25 = vld [vmem:[#allocation2 + $0xa8] sm:$0xff]  ;;  %v112_v26 = vld [vmem:[#allocation2 + $0xb8] sm:$0xff] }
  0x3b   :  { %310 = vmatpush1.msra.mxu0 %v218_v29  ;;  %535 = vmatpush1.msra.mxu1 %v250_v30  ;;  %v84_v27 = vld [vmem:[%s1857_s2 + $0x18] sm:$0xff]  ;;  %v109_v28 = vld [vmem:[#allocation2 + $0xa0] sm:$0xff]  ;;  %v111_v29 = vld [vmem:[#allocation2 + $0xb0] sm:$0xff] }
  0x3c   :  { %311 = vmatprep.subr.mxu0 %v1471_v0  ;;  %536 = vmatprep.subr.mxu1 %v1471_v0  ;;  %v114_v30 = vld [vmem:[#allocation2 + $0xc8] sm:$0xff] }
  0x3d   :  { %312 = vmatpush1.msra.mxu0 %v217_v31  ;;  %537 = vmatpush1.msra.mxu1 %v249_v32  ;;  %v116_v31 = vld [vmem:[#allocation2 + $0xd8] sm:$0xff]  ;;  %v83_v32 = vld [vmem:[%s1857_s2 + $0x10] sm:$0xff] }
  0x3e   :  { %313 = vmatprep.subr.mxu0 %v1471_v0  ;;  %538 = vmatprep.subr.mxu1 %v1471_v0 }
  0x3f   :  { %314 = vmatpush2.msra.mxu0 %v248_v33  ;;  %539 = vmatpush2.msra.mxu1 %v280_v34  ;;  %v113_v33 = vld [vmem:[#allocation2 + $0xc0] sm:$0xff]  ;;  %v115_v34 = vld [vmem:[#allocation2 + $0xd0] sm:$0xff] }
  0x40   :  { %315 = vmatprep.subr.mxu0 %v1471_v0  ;;  %540 = vmatprep.subr.mxu1 %v1471_v0 }
  0x41   :  { %316 = vmatpush2.msra.mxu0 %v247_v35  ;;  %541 = vmatpush2.msra.mxu1 %v279_v36  ;;  %v118_v35 = vld [vmem:[#allocation2 + $0xe8] sm:$0xff]  ;;  %v120_v36 = vld [vmem:[#allocation2 + $0xf8] sm:$0xff] }
  0x42   :  { %317 = vmatprep.subr.mxu0 %v1471_v0  ;;  %542 = vmatprep.subr.mxu1 %v1471_v0 }
  0x43   :  { %318 = vmatpush2.msra.mxu0 %v246_v37  ;;  %543 = vmatpush2.msra.mxu1 %v278_v38  ;;  %v82_v37 = vld [vmem:[%s1857_s2 + $0x8] sm:$0xff]  ;;  %v117_v38 = vld [vmem:[#allocation2 + $0xe0] sm:$0xff] }
  0x44   :  { %319 = vmatprep.subr.mxu0 %v1471_v0  ;;  %544 = vmatprep.subr.mxu1 %v1471_v0 }
  0x45   :  { %320 = vmatpush2.msra.mxu0 %v245_v39  ;;  %545 = vmatpush2.msra.mxu1 %v277_v40  ;;  %v119_v39 = vld [vmem:[#allocation2 + $0xf0] sm:$0xff]  ;;  %v122_v40 = vld [vmem:[#allocation2 + $0x108] sm:$0xff] }
  0x46   :  { %321 = vmatprep.subr.mxu0 %v1471_v0  ;;  %546 = vmatprep.subr.mxu1 %v1471_v0 }
  0x47   :  { %322 = vmatpush2.msra.mxu0 %v244_v41  ;;  %547 = vmatpush2.msra.mxu1 %v276_v42  ;;  %v124_v41 = vld [vmem:[#allocation2 + $0x118] sm:$0xff]  ;;  %v81_v42 = vld [vmem:[%s1857_s2] sm:$0xff] }
  0x48   :  { %323 = vmatprep.subr.mxu0 %v1471_v0  ;;  %548 = vmatprep.subr.mxu1 %v1471_v0 }
  0x49   :  { %324 = vmatpush2.msra.mxu0 %v243_v43  ;;  %549 = vmatpush2.msra.mxu1 %v275_v44  ;;  %v121_v43 = vld [vmem:[#allocation2 + $0x100] sm:$0xff]  ;;  %v123_v44 = vld [vmem:[#allocation2 + $0x110] sm:$0xff] }
  0x4a   :  { %325 = vmatprep.subr.mxu0 %v1471_v0  ;;  %550 = vmatprep.subr.mxu1 %v1471_v0 }
  0x4b   :  { %326 = vmatpush2.msra.mxu0 %v242_v45  ;;  %551 = vmatpush2.msra.mxu1 %v274_v46  ;;  %v126_v45 = vld [vmem:[#allocation2 + $0x128] sm:$0xff]  ;;  %v128_v46 = vld [vmem:[#allocation2 + $0x138] sm:$0xff] }
  0x4c   :  { %327 = vmatprep.subr.mxu0 %v1471_v0  ;;  %552 = vmatprep.subr.mxu1 %v1471_v0 }
  0x4d   :  { %328 = vmatpush2.msra.mxu0 %v241_v47  ;;  %553 = vmatpush2.msra.mxu1 %v273_v48  ;;  %v125_v47 = vld [vmem:[#allocation2 + $0x120] sm:$0xff]  ;;  %v127_v48 = vld [vmem:[#allocation2 + $0x130] sm:$0xff] }
  0x4e   :  { %329 = vmatprep.subr.mxu0 %v1471_v0  ;;  %554 = vmatprep.subr.mxu1 %v1471_v0 }
  0x4f   :  { %330 = vmatpush2.msra.mxu0 %v240_v49  ;;  %555 = vmatpush2.msra.mxu1 %v272_v50  ;;  %v130_v49 = vld [vmem:[#allocation2 + $0x148] sm:$0xff]  ;;  %v132_v50 = vld [vmem:[#allocation2 + $0x158] sm:$0xff] }
  0x50   :  { %331 = vmatprep.subr.mxu0 %v1471_v0  ;;  %556 = vmatprep.subr.mxu1 %v1471_v0 }
  0x51   :  { %332 = vmatpush2.msra.mxu0 %v239_v51  ;;  %557 = vmatpush2.msra.mxu1 %v271_v52  ;;  %v129_v51 = vld [vmem:[#allocation2 + $0x140] sm:$0xff]  ;;  %v131_v52 = vld [vmem:[#allocation2 + $0x150] sm:$0xff] }
  0x52   :  { %333 = vmatprep.subr.mxu0 %v1471_v0  ;;  %558 = vmatprep.subr.mxu1 %v1471_v0 }
  0x53   :  { %334 = vmatpush2.msra.mxu0 %v238_v53  ;;  %559 = vmatpush2.msra.mxu1 %v270_v54  ;;  %v134_v53 = vld [vmem:[#allocation2 + $0x168] sm:$0xff]  ;;  %v136_v54 = vld [vmem:[#allocation2 + $0x178] sm:$0xff] }
  0x54   :  { %335 = vmatprep.subr.mxu0 %v1471_v0  ;;  %560 = vmatprep.subr.mxu1 %v1471_v0 }
  0x55   :  { %336 = vmatpush2.msra.mxu0 %v237_v55  ;;  %561 = vmatpush2.msra.mxu1 %v269_v56  ;;  %v133_v55 = vld [vmem:[#allocation2 + $0x160] sm:$0xff]  ;;  %v135_v56 = vld [vmem:[#allocation2 + $0x170] sm:$0xff] }
  0x56   :  { %337 = vmatprep.subr.mxu0 %v1471_v0  ;;  %562 = vmatprep.subr.mxu1 %v1471_v0 }
  0x57   :  { %338 = vmatpush2.msra.mxu0 %v236_v57  ;;  %563 = vmatpush2.msra.mxu1 %v268_v58  ;;  %v138_v57 = vld [vmem:[#allocation2 + $0x188] sm:$0xff]  ;;  %v140_v58 = vld [vmem:[#allocation2 + $0x198] sm:$0xff] }
  0x58   :  { %339 = vmatprep.subr.mxu0 %v1471_v0  ;;  %564 = vmatprep.subr.mxu1 %v1471_v0 }
  0x59   :  { %340 = vmatpush2.msra.mxu0 %v235_v59  ;;  %565 = vmatpush2.msra.mxu1 %v267_v60  ;;  %v137_v59 = vld [vmem:[#allocation2 + $0x180] sm:$0xff]  ;;  %v139_v60 = vld [vmem:[#allocation2 + $0x190] sm:$0xff] }
  0x5a   :  { %341 = vmatprep.subr.mxu0 %v1471_v0  ;;  %566 = vmatprep.subr.mxu1 %v1471_v0 }
  0x5b   :  { %342 = vmatpush2.msra.mxu0 %v234_v61  ;;  %567 = vmatpush2.msra.mxu1 %v266_v62  ;;  %v142_v61 = vld [vmem:[#allocation2 + $0x1a8] sm:$0xff]  ;;  %v144_v62 = vld [vmem:[#allocation2 + $0x1b8] sm:$0xff] }
  0x5c   :  { %343 = vmatprep.subr.mxu0 %v1471_v0  ;;  %568 = vmatprep.subr.mxu1 %v1471_v0  ;;  %v98_v0 = vld [vmem:[#allocation2 + $0x48] sm:$0xff] }
  0x5d   :  { %344 = vmatpush2.msra.mxu0 %v233_v63  ;;  %345 = vmatprep.mubr.f32.mxu0 %v90_v1  ;;  %v141_v63 = vld [vmem:[#allocation2 + $0x1a0] sm:$0xff]  ;;  %v143_v1 = vld [vmem:[#allocation2 + $0x1b0] sm:$0xff] }
  0x5e   :  { %569 = vmatpush2.msra.mxu1 %v265_v2  ;;  %570 = vmatprep.mubr.f32.mxu1 %v92_v3  ;;  %v146_v2 = vld [vmem:[#allocation2 + $0x1c8] sm:$0xff]  ;;  %v148_v3 = vld [vmem:[#allocation2 + $0x1d8] sm:$0xff] }
  0x5f   :  { %346 = vmatmul.mubr.f32.vlgmr.msra.gmra.mxu0 %v89_v4  ;;  %571 = vmatmul.mubr.f32.vlgmr.msra.gmra.mxu1 %v91_v5  ;;  %v145_v4 = vld [vmem:[#allocation2 + $0x1c0] sm:$0xff]  ;;  %v147_v5 = vld [vmem:[#allocation2 + $0x1d0] sm:$0xff] }
  0x60   :  { %1311 = vmatprep.subr.mxu0 %v88_v6  ;;  %1375 = vmatprep.subr.mxu1 %v88_v6 }
  0x61   :  { %1312 = vmatpush3.msra.mxu0 %v88_v6  ;;  %1383 = vmatpush3.msra.mxu1 %v88_v6  ;;  %v150_v6 = vld [vmem:[#allocation2 + $0x1e8] sm:$0xff] }
  0x62   :  { %350 = vmatprep.mubr.f32.mxu0 %v94_v7  ;;  %575 = vmatprep.mubr.f32.mxu1 %v96_v8  ;;  %v152_v7 = vld [vmem:[#allocation2 + $0x1f8] sm:$0xff]  ;;  %v149_v8 = vld [vmem:[#allocation2 + $0x1e0] sm:$0xff] }
  0x63   :  { %351 = vmatmul.mubr.f32.gmra.mxu0 %v93_v9  ;;  %576 = vmatmul.mubr.f32.gmra.mxu1 %v95_v10  ;;  %v151_v9 = vld [vmem:[#allocation2 + $0x1f0] sm:$0xff]  ;;  %v154_v10 = vld [vmem:[#allocation2 + $0x208] sm:$0xff] }
  0x64   :  { %355 = vmatprep.mubr.f32.mxu0 %v98_v0  ;;  %580 = vmatprep.mubr.f32.mxu1 %v100_v11  ;;  %v156_v0 = vld [vmem:[#allocation2 + $0x218] sm:$0xff]  ;;  %v153_v11 = vld [vmem:[#allocation2 + $0x200] sm:$0xff] }
  0x65   :  { %1313 = vmatprep.subr.mxu0 %v87_v12  ;;  %1376 = vmatprep.subr.mxu1 %v87_v12 }
  0x66   :  { %1314 = vmatpush3.msra.mxu0 %v87_v12  ;;  %1384 = vmatpush3.msra.mxu1 %v87_v12  ;;  %v155_v12 = vld [vmem:[#allocation2 + $0x210] sm:$0xff] }
  0x67   :  { %356 = vmatmul.mubr.f32.gmra.mxu0 %v97_v13  ;;  %581 = vmatmul.mubr.f32.gmra.mxu1 %v99_v14  ;;  %v158_v13 = vld [vmem:[#allocation2 + $0x228] sm:$0xff]  ;;  %v160_v14 = vld [vmem:[#allocation2 + $0x238] sm:$0xff] }
  0x68   :  { %360 = vmatprep.mubr.f32.mxu0 %v102_v15  ;;  %585 = vmatprep.mubr.f32.mxu1 %v104_v16  ;;  %v157_v15 = vld [vmem:[#allocation2 + $0x220] sm:$0xff]  ;;  %v159_v16 = vld [vmem:[#allocation2 + $0x230] sm:$0xff] }
  0x69   :  { %1315 = vmatprep.subr.mxu0 %v86_v17  ;;  %1377 = vmatprep.subr.mxu1 %v86_v17 }
  0x6a   :  { %1316 = vmatpush3.msra.mxu0 %v86_v17  ;;  %1385 = vmatpush3.msra.mxu1 %v86_v17  ;;  %v162_v17 = vld [vmem:[#allocation2 + $0x248] sm:$0xff] }
  0x6b   :  { %361 = vmatmul.mubr.f32.gmra.mxu0 %v101_v18  ;;  %586 = vmatmul.mubr.f32.gmra.mxu1 %v103_v19  ;;  %v164_v18 = vld [vmem:[#allocation2 + $0x258] sm:$0xff]  ;;  %v161_v19 = vld [vmem:[#allocation2 + $0x240] sm:$0xff] }
  0x6c   :  { %365 = vmatprep.mubr.f32.mxu0 %v106_v20  ;;  %590 = vmatprep.mubr.f32.mxu1 %v108_v21  ;;  %v163_v20 = vld [vmem:[#allocation2 + $0x250] sm:$0xff]  ;;  %v166_v21 = vld [vmem:[#allocation2 + $0x268] sm:$0xff] }
  0x6d   :  { %1317 = vmatprep.subr.mxu0 %v85_v22  ;;  %1378 = vmatprep.subr.mxu1 %v85_v22 }
  0x6e   :  { %1318 = vmatpush3.msra.mxu0 %v85_v22  ;;  %1386 = vmatpush3.msra.mxu1 %v85_v22  ;;  %v168_v22 = vld [vmem:[#allocation2 + $0x278] sm:$0xff] }
  0x6f   :  { %366 = vmatmul.mubr.f32.gmra.mxu0 %v105_v23  ;;  %591 = vmatmul.mubr.f32.gmra.mxu1 %v107_v24  ;;  %v165_v23 = vld [vmem:[#allocation2 + $0x260] sm:$0xff]  ;;  %v167_v24 = vld [vmem:[#allocation2 + $0x270] sm:$0xff] }
  0x70   :  { %370 = vmatprep.mubr.f32.mxu0 %v110_v25  ;;  %595 = vmatprep.mubr.f32.mxu1 %v112_v26  ;;  %v170_v25 = vld [vmem:[#allocation2 + $0x288] sm:$0xff]  ;;  %v172_v26 = vld [vmem:[#allocation2 + $0x298] sm:$0xff] }
  0x71   :  { %1319 = vmatprep.subr.mxu0 %v84_v27  ;;  %1379 = vmatprep.subr.mxu1 %v84_v27 }
  0x72   :  { %1320 = vmatpush3.msra.mxu0 %v84_v27  ;;  %1387 = vmatpush3.msra.mxu1 %v84_v27  ;;  %v169_v27 = vld [vmem:[#allocation2 + $0x280] sm:$0xff] }
  0x73   :  { %371 = vmatmul.mubr.f32.gmra.mxu0 %v109_v28  ;;  %596 = vmatmul.mubr.f32.gmra.mxu1 %v111_v29  ;;  %v171_v28 = vld [vmem:[#allocation2 + $0x290] sm:$0xff]  ;;  %v174_v29 = vld [vmem:[#allocation2 + $0x2a8] sm:$0xff] }
  0x74   :  { %375 = vmatprep.mubr.f32.mxu0 %v114_v30  ;;  %600 = vmatprep.mubr.f32.mxu1 %v116_v31  ;;  %v176_v30 = vld [vmem:[#allocation2 + $0x2b8] sm:$0xff]  ;;  %v173_v31 = vld [vmem:[#allocation2 + $0x2a0] sm:$0xff] }
  0x75   :  { %1321 = vmatprep.subr.mxu0 %v83_v32  ;;  %1380 = vmatprep.subr.mxu1 %v83_v32 }
  0x76   :  { %1322 = vmatpush3.msra.mxu0 %v83_v32  ;;  %1388 = vmatpush3.msra.mxu1 %v83_v32  ;;  %v175_v32 = vld [vmem:[#allocation2 + $0x2b0] sm:$0xff] }
  0x77   :  { %376 = vmatmul.mubr.f32.gmra.mxu0 %v113_v33  ;;  %601 = vmatmul.mubr.f32.gmra.mxu1 %v115_v34  ;;  %v178_v33 = vld [vmem:[#allocation2 + $0x2c8] sm:$0xff]  ;;  %v180_v34 = vld [vmem:[#allocation2 + $0x2d8] sm:$0xff] }
  0x78   :  { %380 = vmatprep.mubr.f32.mxu0 %v118_v35  ;;  %605 = vmatprep.mubr.f32.mxu1 %v120_v36  ;;  %v177_v35 = vld [vmem:[#allocation2 + $0x2c0] sm:$0xff]  ;;  %v179_v36 = vld [vmem:[#allocation2 + $0x2d0] sm:$0xff] }
  0x79   :  { %1323 = vmatprep.subr.mxu0 %v82_v37  ;;  %1381 = vmatprep.subr.mxu1 %v82_v37 }
  0x7a   :  { %1324 = vmatpush3.msra.mxu0 %v82_v37  ;;  %1389 = vmatpush3.msra.mxu1 %v82_v37  ;;  %v182_v37 = vld [vmem:[#allocation2 + $0x2e8] sm:$0xff] }
  0x7b   :  { %381 = vmatmul.mubr.f32.gmra.mxu0 %v117_v38  ;;  %606 = vmatmul.mubr.f32.gmra.mxu1 %v119_v39  ;;  %v184_v38 = vld [vmem:[#allocation2 + $0x2f8] sm:$0xff]  ;;  %v181_v39 = vld [vmem:[#allocation2 + $0x2e0] sm:$0xff] }
  0x7c   :  { %385 = vmatprep.mubr.f32.mxu0 %v122_v40  ;;  %610 = vmatprep.mubr.f32.mxu1 %v124_v41  ;;  %v183_v40 = vld [vmem:[#allocation2 + $0x2f0] sm:$0xff]  ;;  %v186_v41 = vld [vmem:[#allocation2 + $0x308] sm:$0xff] }
  0x7d   :  { %1325 = vmatprep.subr.mxu0 %v81_v42  ;;  %1382 = vmatprep.subr.mxu1 %v81_v42 }
  0x7e   :  { %1326 = vmatpush3.msra.mxu0 %v81_v42  ;;  %1390 = vmatpush3.msra.mxu1 %v81_v42  ;;  %v188_v42 = vld [vmem:[#allocation2 + $0x318] sm:$0xff] }
  0x7f   :  { %386 = vmatmul.mubr.f32.gmra.mxu0 %v121_v43  ;;  %611 = vmatmul.mubr.f32.gmra.mxu1 %v123_v44  ;;  %v185_v43 = vld [vmem:[#allocation2 + $0x300] sm:$0xff]  ;;  %v187_v44 = vld [vmem:[#allocation2 + $0x310] sm:$0xff] }
  0x80   :  { %390 = vmatprep.mubr.f32.mxu0 %v126_v45  ;;  %615 = vmatprep.mubr.f32.mxu1 %v128_v46  ;;  %v190_v45 = vld [vmem:[#allocation2 + $0x328] sm:$0xff]  ;;  %v192_v46 = vld [vmem:[#allocation2 + $0x338] sm:$0xff] }
  0x83   :  { %391 = vmatmul.mubr.f32.gmra.mxu0 %v125_v47  ;;  %616 = vmatmul.mubr.f32.gmra.mxu1 %v127_v48  ;;  %v189_v47 = vld [vmem:[#allocation2 + $0x320] sm:$0xff]  ;;  %v191_v48 = vld [vmem:[#allocation2 + $0x330] sm:$0xff] }
  0x84   :  { %395 = vmatprep.mubr.f32.mxu0 %v130_v49  ;;  %620 = vmatprep.mubr.f32.mxu1 %v132_v50  ;;  %v194_v49 = vld [vmem:[#allocation2 + $0x348] sm:$0xff]  ;;  %v196_v50 = vld [vmem:[#allocation2 + $0x358] sm:$0xff] }
  0x87   :  { %396 = vmatmul.mubr.f32.gmra.mxu0 %v129_v51  ;;  %621 = vmatmul.mubr.f32.gmra.mxu1 %v131_v52  ;;  %v193_v51 = vld [vmem:[#allocation2 + $0x340] sm:$0xff]  ;;  %v195_v52 = vld [vmem:[#allocation2 + $0x350] sm:$0xff] }
  0x88   :  { %400 = vmatprep.mubr.f32.mxu0 %v134_v53  ;;  %625 = vmatprep.mubr.f32.mxu1 %v136_v54  ;;  %v198_v53 = vld [vmem:[#allocation2 + $0x368] sm:$0xff]  ;;  %v200_v54 = vld [vmem:[#allocation2 + $0x378] sm:$0xff] }
  0x8b   :  { %401 = vmatmul.mubr.f32.gmra.mxu0 %v133_v55  ;;  %626 = vmatmul.mubr.f32.gmra.mxu1 %v135_v56  ;;  %v197_v55 = vld [vmem:[#allocation2 + $0x360] sm:$0xff]  ;;  %v199_v56 = vld [vmem:[#allocation2 + $0x370] sm:$0xff] }
  0x8c   :  { %405 = vmatprep.mubr.f32.mxu0 %v138_v57  ;;  %630 = vmatprep.mubr.f32.mxu1 %v140_v58  ;;  %v202_v57 = vld [vmem:[#allocation2 + $0x388] sm:$0xff]  ;;  %v204_v58 = vld [vmem:[#allocation2 + $0x398] sm:$0xff] }
  0x8f   :  { %406 = vmatmul.mubr.f32.gmra.mxu0 %v137_v59  ;;  %631 = vmatmul.mubr.f32.gmra.mxu1 %v139_v60  ;;  %v201_v59 = vld [vmem:[#allocation2 + $0x380] sm:$0xff]  ;;  %v203_v60 = vld [vmem:[#allocation2 + $0x390] sm:$0xff] }
  0x90   :  { %410 = vmatprep.mubr.f32.mxu0 %v142_v61  ;;  %635 = vmatprep.mubr.f32.mxu1 %v144_v62  ;;  %v206_v61 = vld [vmem:[#allocation2 + $0x3a8] sm:$0xff]  ;;  %v208_v62 = vld [vmem:[#allocation2 + $0x3b8] sm:$0xff] }
  0x93   :  { %411 = vmatmul.mubr.f32.gmra.mxu0 %v141_v63  ;;  %636 = vmatmul.mubr.f32.gmra.mxu1 %v143_v1  ;;  %v205_v63 = vld [vmem:[#allocation2 + $0x3a0] sm:$0xff]  ;;  %v207_v1 = vld [vmem:[#allocation2 + $0x3b0] sm:$0xff] }
  0x94   :  { %415 = vmatprep.mubr.f32.mxu0 %v146_v2  ;;  %640 = vmatprep.mubr.f32.mxu1 %v148_v3  ;;  %v210_v2 = vld [vmem:[#allocation2 + $0x3c8] sm:$0xff]  ;;  %v212_v3 = vld [vmem:[#allocation2 + $0x3d8] sm:$0xff] }
  0x97   :  { %416 = vmatmul.mubr.f32.gmra.mxu0 %v145_v4  ;;  %641 = vmatmul.mubr.f32.gmra.mxu1 %v147_v5  ;;  %v209_v4 = vld [vmem:[#allocation2 + $0x3c0] sm:$0xff]  ;;  %v211_v5 = vld [vmem:[#allocation2 + $0x3d0] sm:$0xff] }
  0x98   :  { %420 = vmatprep.mubr.f32.mxu0 %v150_v6  ;;  %645 = vmatprep.mubr.f32.mxu1 %v152_v7  ;;  %v214_v6 = vld [vmem:[#allocation2 + $0x3e8] sm:$0xff]  ;;  %v216_v7 = vld [vmem:[#allocation2 + $0x3f8] sm:$0xff] }
  0x9b   :  { %421 = vmatmul.mubr.f32.gmra.mxu0 %v149_v8  ;;  %646 = vmatmul.mubr.f32.gmra.mxu1 %v151_v9  ;;  %v213_v8 = vld [vmem:[#allocation2 + $0x3e0] sm:$0xff]  ;;  %v215_v9 = vld [vmem:[#allocation2 + $0x3f0] sm:$0xff] }
  0x9c   :  { %425 = vmatprep.mubr.f32.mxu0 %v154_v10  ;;  %650 = vmatprep.mubr.f32.mxu1 %v156_v0  ;;  %v49_v10 = vld [vmem:[%s1855_s0] sm:$0xff] }
  0x9d   :  { %v65_v0 = vld [vmem:[%s1855_s0 + $0x80] sm:$0xff] }
  0x9f   :  { %426 = vmatmul.mubr.f32.gmra.mxu0 %v153_v11  ;;  %651 = vmatmul.mubr.f32.gmra.mxu1 %v155_v12  ;;  %v50_v11 = vld [vmem:[%s1855_s0 + $0x8] sm:$0xff] }
  0xa0   :  { %430 = vmatprep.mubr.f32.mxu0 %v158_v13  ;;  %655 = vmatprep.mubr.f32.mxu1 %v160_v14  ;;  %v66_v12 = vld [vmem:[%s1855_s0 + $0x88] sm:$0xff]  ;;  %v51_v13 = vld [vmem:[%s1855_s0 + $0x10] sm:$0xff] }
  0xa1   :  { %v67_v14 = vld [vmem:[%s1855_s0 + $0x90] sm:$0xff] }
  0xa3   :  { %431 = vmatmul.mubr.f32.gmra.mxu0 %v157_v15  ;;  %656 = vmatmul.mubr.f32.gmra.mxu1 %v159_v16  ;;  %v52_v15 = vld [vmem:[%s1855_s0 + $0x18] sm:$0xff] }
  0xa4   :  { %435 = vmatprep.mubr.f32.mxu0 %v162_v17  ;;  %660 = vmatprep.mubr.f32.mxu1 %v164_v18  ;;  %v68_v16 = vld [vmem:[%s1855_s0 + $0x98] sm:$0xff]  ;;  %v53_v17 = vld [vmem:[%s1855_s0 + $0x20] sm:$0xff] }
  0xa5   :  { %v69_v18 = vld [vmem:[%s1855_s0 + $0xa0] sm:$0xff] }
  0xa7   :  { %436 = vmatmul.mubr.f32.gmra.mxu0 %v161_v19  ;;  %661 = vmatmul.mubr.f32.gmra.mxu1 %v163_v20  ;;  %v54_v19 = vld [vmem:[%s1855_s0 + $0x28] sm:$0xff] }
  0xa8   :  { %440 = vmatprep.mubr.f32.mxu0 %v166_v21  ;;  %665 = vmatprep.mubr.f32.mxu1 %v168_v22  ;;  %v70_v20 = vld [vmem:[%s1855_s0 + $0xa8] sm:$0xff]  ;;  %v55_v21 = vld [vmem:[%s1855_s0 + $0x30] sm:$0xff] }
  0xa9   :  { %v71_v22 = vld [vmem:[%s1855_s0 + $0xb0] sm:$0xff] }
  0xab   :  { %441 = vmatmul.mubr.f32.gmra.mxu0 %v165_v23  ;;  %666 = vmatmul.mubr.f32.gmra.mxu1 %v167_v24  ;;  %v56_v23 = vld [vmem:[%s1855_s0 + $0x38] sm:$0xff] }
  0xac   :  { %445 = vmatprep.mubr.f32.mxu0 %v170_v25  ;;  %670 = vmatprep.mubr.f32.mxu1 %v172_v26  ;;  %v72_v24 = vld [vmem:[%s1855_s0 + $0xb8] sm:$0xff]  ;;  %v57_v25 = vld [vmem:[%s1855_s0 + $0x40] sm:$0xff] }
  0xad   :  { %v73_v26 = vld [vmem:[%s1855_s0 + $0xc0] sm:$0xff] }
  0xaf   :  { %446 = vmatmul.mubr.f32.gmra.mxu0 %v169_v27  ;;  %671 = vmatmul.mubr.f32.gmra.mxu1 %v171_v28  ;;  %v58_v27 = vld [vmem:[%s1855_s0 + $0x48] sm:$0xff] }
  0xb0   :  { %450 = vmatprep.mubr.f32.mxu0 %v174_v29  ;;  %675 = vmatprep.mubr.f32.mxu1 %v176_v30  ;;  %v74_v28 = vld [vmem:[%s1855_s0 + $0xc8] sm:$0xff]  ;;  %v59_v29 = vld [vmem:[%s1855_s0 + $0x50] sm:$0xff] }
  0xb1   :  { %v75_v30 = vld [vmem:[%s1855_s0 + $0xd0] sm:$0xff] }
  0xb3   :  { %451 = vmatmul.mubr.f32.gmra.mxu0 %v173_v31  ;;  %676 = vmatmul.mubr.f32.gmra.mxu1 %v175_v32  ;;  %v60_v31 = vld [vmem:[%s1855_s0 + $0x58] sm:$0xff] }
  0xb4   :  { %455 = vmatprep.mubr.f32.mxu0 %v178_v33  ;;  %680 = vmatprep.mubr.f32.mxu1 %v180_v34  ;;  %v76_v32 = vld [vmem:[%s1855_s0 + $0xd8] sm:$0xff]  ;;  %v61_v33 = vld [vmem:[%s1855_s0 + $0x60] sm:$0xff] }
  0xb5   :  { %v77_v34 = vld [vmem:[%s1855_s0 + $0xe0] sm:$0xff] }
  0xb7   :  { %456 = vmatmul.mubr.f32.gmra.mxu0 %v177_v35  ;;  %681 = vmatmul.mubr.f32.gmra.mxu1 %v179_v36  ;;  %v62_v35 = vld [vmem:[%s1855_s0 + $0x68] sm:$0xff] }
  0xb8   :  { %460 = vmatprep.mubr.f32.mxu0 %v182_v37  ;;  %685 = vmatprep.mubr.f32.mxu1 %v184_v38  ;;  %v78_v36 = vld [vmem:[%s1855_s0 + $0xe8] sm:$0xff]  ;;  %v63_v37 = vld [vmem:[%s1855_s0 + $0x70] sm:$0xff] }
  0xb9   :  { %v79_v38 = vld [vmem:[%s1855_s0 + $0xf0] sm:$0xff] }
  0xbb   :  { %461 = vmatmul.mubr.f32.gmra.mxu0 %v181_v39  ;;  %686 = vmatmul.mubr.f32.gmra.mxu1 %v183_v40  ;;  %v64_v39 = vld [vmem:[%s1855_s0 + $0x78] sm:$0xff] }
  0xbc   :  { %465 = vmatprep.mubr.f32.mxu0 %v186_v41  ;;  %690 = vmatprep.mubr.f32.mxu1 %v188_v42  ;;  %v80_v40 = vld [vmem:[%s1855_s0 + $0xf8] sm:$0xff] }
  0xbf   :  { %466 = vmatmul.mubr.f32.gmra.mxu0 %v185_v43  ;;  %691 = vmatmul.mubr.f32.gmra.mxu1 %v187_v44 }
  0xc0   :  { %470 = vmatprep.mubr.f32.mxu0 %v190_v45  ;;  %695 = vmatprep.mubr.f32.mxu1 %v192_v46 }
  0xc3   :  { %471 = vmatmul.mubr.f32.gmra.mxu0 %v189_v47  ;;  %696 = vmatmul.mubr.f32.gmra.mxu1 %v191_v48 }
  0xc4   :  { %475 = vmatprep.mubr.f32.mxu0 %v194_v49  ;;  %700 = vmatprep.mubr.f32.mxu1 %v196_v50 }
  0xc7   :  { %476 = vmatmul.mubr.f32.gmra.mxu0 %v193_v51  ;;  %701 = vmatmul.mubr.f32.gmra.mxu1 %v195_v52 }
  0xc8   :  { %480 = vmatprep.mubr.f32.mxu0 %v198_v53  ;;  %705 = vmatprep.mubr.f32.mxu1 %v200_v54 }
  0xcb   :  { %481 = vmatmul.mubr.f32.gmra.mxu0 %v197_v55  ;;  %706 = vmatmul.mubr.f32.gmra.mxu1 %v199_v56 }
  0xcc   :  { %485 = vmatprep.mubr.f32.mxu0 %v202_v57  ;;  %710 = vmatprep.mubr.f32.mxu1 %v204_v58 }
  0xcf   :  { %486 = vmatmul.mubr.f32.gmra.mxu0 %v201_v59  ;;  %711 = vmatmul.mubr.f32.gmra.mxu1 %v203_v60 }
  0xd0   :  { %490 = vmatprep.mubr.f32.mxu0 %v206_v61  ;;  %715 = vmatprep.mubr.f32.mxu1 %v208_v62 }
  0xd3   :  { %491 = vmatmul.mubr.f32.gmra.mxu0 %v205_v63  ;;  %716 = vmatmul.mubr.f32.gmra.mxu1 %v207_v1 }
  0xd4   :  { %495 = vmatprep.mubr.f32.mxu0 %v210_v2  ;;  %720 = vmatprep.mubr.f32.mxu1 %v212_v3 }
  0xd7   :  { %496 = vmatmul.mubr.f32.gmra.mxu0 %v209_v4  ;;  %721 = vmatmul.mubr.f32.gmra.mxu1 %v211_v5 }
  0xd8   :  { %500 = vmatprep.mubr.f32.mxu0 %v214_v6  ;;  %725 = vmatprep.mubr.f32.mxu1 %v216_v7 }
  0xdb   :  { %501 = vmatmul.mubr.f32.gmra.mxu0 %v213_v8  ;;  %726 = vmatmul.mubr.f32.gmra.mxu1 %v215_v9 }
  0xdc   :  { %1327 = vmatprep.mubr.msk.f32.mxu0 %vm731_vm0, %v49_v10  ;;  %1351 = vmatprep.mubr.msk.f32.mxu1 %vm731_vm0, %v65_v0 }
  0xdf   :  { %1328 = vmatmul.mubr.msk.f32.vlgmr.msra.gmra.mxu0 %vm731_vm0, %v50_v11  ;;  %1352 = vmatmul.mubr.msk.f32.vlgmr.msra.gmra.mxu1 %vm731_vm0, %v66_v12 }
  0xe0   :  { %1330 = vmatprep.mubr.msk.f32.mxu0 %vm731_vm0, %v51_v13  ;;  %1354 = vmatprep.mubr.msk.f32.mxu1 %vm731_vm0, %v67_v14 }
  0xe3   :  { %1331 = vmatmul.mubr.msk.f32.gmra.mxu0 %vm731_vm0, %v52_v15  ;;  %1355 = vmatmul.mubr.msk.f32.gmra.mxu1 %vm731_vm0, %v68_v16 }
  0xe4   :  { %1333 = vmatprep.mubr.msk.f32.mxu0 %vm731_vm0, %v53_v17  ;;  %1357 = vmatprep.mubr.msk.f32.mxu1 %vm731_vm0, %v69_v18 }
  0xe7   :  { %1334 = vmatmul.mubr.msk.f32.gmra.mxu0 %vm731_vm0, %v54_v19  ;;  %1358 = vmatmul.mubr.msk.f32.gmra.mxu1 %vm731_vm0, %v70_v20 }
  0xe8   :  { %1336 = vmatprep.mubr.msk.f32.mxu0 %vm731_vm0, %v55_v21  ;;  %1360 = vmatprep.mubr.msk.f32.mxu1 %vm731_vm0, %v71_v22 }
  0xeb   :  { %1337 = vmatmul.mubr.msk.f32.gmra.mxu0 %vm731_vm0, %v56_v23  ;;  %1361 = vmatmul.mubr.msk.f32.gmra.mxu1 %vm731_vm0, %v72_v24 }
  0xec   :  { %1339 = vmatprep.mubr.msk.f32.mxu0 %vm731_vm0, %v57_v25  ;;  %1363 = vmatprep.mubr.msk.f32.mxu1 %vm731_vm0, %v73_v26 }
  0xef   :  { %1340 = vmatmul.mubr.msk.f32.gmra.mxu0 %vm731_vm0, %v58_v27  ;;  %1364 = vmatmul.mubr.msk.f32.gmra.mxu1 %vm731_vm0, %v74_v28 }
  0xf0   :  { %1342 = vmatprep.mubr.msk.f32.mxu0 %vm731_vm0, %v59_v29  ;;  %1366 = vmatprep.mubr.msk.f32.mxu1 %vm731_vm0, %v75_v30 }
  0xf3   :  { %1343 = vmatmul.mubr.msk.f32.gmra.mxu0 %vm731_vm0, %v60_v31  ;;  %1367 = vmatmul.mubr.msk.f32.gmra.mxu1 %vm731_vm0, %v76_v32 }
  0xf4   :  { %1345 = vmatprep.mubr.msk.f32.mxu0 %vm731_vm0, %v61_v33  ;;  %1369 = vmatprep.mubr.msk.f32.mxu1 %vm731_vm0, %v77_v34 }
  0xf7   :  { %1346 = vmatmul.mubr.msk.f32.gmra.mxu0 %vm731_vm0, %v62_v35  ;;  %1370 = vmatmul.mubr.msk.f32.gmra.mxu1 %vm731_vm0, %v78_v36 }
  0xf8   :  { %1348 = vmatprep.mubr.msk.f32.mxu0 %vm731_vm0, %v63_v37  ;;  %1372 = vmatprep.mubr.msk.f32.mxu1 %vm731_vm0, %v79_v38 }
  0xfb   :  { %1349 = vmatmul.mubr.msk.f32.gmra.mxu0 %vm731_vm0, %v64_v39  ;;  %1373 = vmatmul.mubr.msk.f32.gmra.mxu1 %vm731_vm0, %v80_v40 }
 0x11f   :  { %v347_v41 = vpop.f32.mrf.mxu0  ;;  %v572_v42 = vpop.f32.mrf.mxu1 }
 0x120   :  { %v1728_v43 = vadd.f32 %v572_v42, %v347_v41 }
 0x121   :  { %v349_v44 = vpop.f32.mrf.mxu0  ;;  %v574_v45 = vpop.f32.mrf.mxu1 }
 0x123   :  { %v352_v46 = vpop.f32.mrf.mxu0  ;;  %v577_v47 = vpop.f32.mrf.mxu1 }
 0x124   :  { %v1730_v48 = vadd.f32 %v577_v47, %v352_v46 }
 0x125   :  { %v354_v49 = vpop.f32.mrf.mxu0  ;;  %v579_v50 = vpop.f32.mrf.mxu1 }
 0x127   :  { %v357_v51 = vpop.f32.mrf.mxu0  ;;  %v582_v52 = vpop.f32.mrf.mxu1 }
 0x128   :  { %v1732_v53 = vadd.f32 %v582_v52, %v357_v51 }
 0x129   :  { %v359_v54 = vpop.f32.mrf.mxu0  ;;  %v584_v55 = vpop.f32.mrf.mxu1 }
 0x12b   :  { %v362_v56 = vpop.f32.mrf.mxu0  ;;  %v587_v57 = vpop.f32.mrf.mxu1 }
 0x12c   :  { %v1734_v58 = vadd.f32 %v587_v57, %v362_v56 }
 0x12d   :  { %v364_v59 = vpop.f32.mrf.mxu0  ;;  %v589_v60 = vpop.f32.mrf.mxu1 }
 0x12f   :  { %v367_v61 = vpop.f32.mrf.mxu0  ;;  %v592_v62 = vpop.f32.mrf.mxu1 }
 0x130   :  { %v1736_v63 = vadd.f32 %v592_v62, %v367_v61 }
 0x131   :  { %v369_v1 = vpop.f32.mrf.mxu0  ;;  %v594_v2 = vpop.f32.mrf.mxu1 }
 0x133   :  { %v372_v3 = vpop.f32.mrf.mxu0  ;;  %v597_v4 = vpop.f32.mrf.mxu1 }
 0x134   :  { %v1738_v5 = vadd.f32 %v597_v4, %v372_v3 }
 0x135   :  { %v374_v6 = vpop.f32.mrf.mxu0  ;;  %v599_v7 = vpop.f32.mrf.mxu1 }
 0x137   :  { %v377_v8 = vpop.f32.mrf.mxu0  ;;  %v602_v9 = vpop.f32.mrf.mxu1 }
 0x138   :  { %v1740_v10 = vadd.f32 %v602_v9, %v377_v8 }
 0x139   :  { %v379_v0 = vpop.f32.mrf.mxu0  ;;  %v604_v11 = vpop.f32.mrf.mxu1 }
 0x13b   :  { %v382_v12 = vpop.f32.mrf.mxu0  ;;  %v607_v13 = vpop.f32.mrf.mxu1 }
 0x13c   :  { %v1742_v14 = vadd.f32 %v607_v13, %v382_v12 }
 0x13d   :  { %v384_v15 = vpop.f32.mrf.mxu0  ;;  %v609_v16 = vpop.f32.mrf.mxu1 }
 0x13f   :  { %v387_v17 = vpop.f32.mrf.mxu0  ;;  %v612_v18 = vpop.f32.mrf.mxu1 }
 0x140   :  { %v1744_v19 = vadd.f32 %v612_v18, %v387_v17 }
 0x141   :  { %v389_v20 = vpop.f32.mrf.mxu0  ;;  %v614_v21 = vpop.f32.mrf.mxu1 }
 0x143   :  { %v392_v22 = vpop.f32.mrf.mxu0  ;;  %v617_v23 = vpop.f32.mrf.mxu1 }
 0x144   :  { %v1746_v24 = vadd.f32 %v617_v23, %v392_v22 }
 0x145   :  { %v394_v25 = vpop.f32.mrf.mxu0  ;;  %v619_v26 = vpop.f32.mrf.mxu1 }
 0x147   :  { %v397_v27 = vpop.f32.mrf.mxu0  ;;  %v622_v28 = vpop.f32.mrf.mxu1 }
 0x148   :  { %v1748_v29 = vadd.f32 %v622_v28, %v397_v27 }
 0x149   :  { %v399_v30 = vpop.f32.mrf.mxu0  ;;  %v624_v31 = vpop.f32.mrf.mxu1 }
 0x14b   :  { %v402_v32 = vpop.f32.mrf.mxu0  ;;  %v627_v33 = vpop.f32.mrf.mxu1 }
 0x14c   :  { %v1750_v34 = vadd.f32 %v627_v33, %v402_v32 }
 0x14d   :  { %v404_v35 = vpop.f32.mrf.mxu0  ;;  %v629_v36 = vpop.f32.mrf.mxu1 }
 0x14f   :  { %v407_v37 = vpop.f32.mrf.mxu0  ;;  %v632_v38 = vpop.f32.mrf.mxu1 }
 0x150   :  { %v1752_v39 = vadd.f32 %v632_v38, %v407_v37 }
 0x151   :  { %v409_v40 = vpop.f32.mrf.mxu0  ;;  %v634_v41 = vpop.f32.mrf.mxu1 }
 0x153   :  { %v412_v42 = vpop.f32.mrf.mxu0  ;;  %v637_v44 = vpop.f32.mrf.mxu1 }
 0x154   :  { %v1754_v45 = vadd.f32 %v637_v44, %v412_v42 }
 0x155   :  { %v414_v46 = vpop.f32.mrf.mxu0  ;;  %v639_v47 = vpop.f32.mrf.mxu1 }
 0x157   :  { %v417_v49 = vpop.f32.mrf.mxu0  ;;  %v642_v50 = vpop.f32.mrf.mxu1 }
 0x158   :  { %v1756_v51 = vadd.f32 %v642_v50, %v417_v49 }
 0x159   :  { %v419_v52 = vpop.f32.mrf.mxu0  ;;  %v644_v54 = vpop.f32.mrf.mxu1 }
 0x15b   :  { %v422_v55 = vpop.f32.mrf.mxu0  ;;  %v647_v56 = vpop.f32.mrf.mxu1 }
 0x15c   :  { %v1758_v57 = vadd.f32 %v647_v56, %v422_v55 }
 0x15d   :  { %v424_v59 = vpop.f32.mrf.mxu0  ;;  %v649_v60 = vpop.f32.mrf.mxu1 }
 0x15f   :  { %v427_v61 = vpop.f32.mrf.mxu0  ;;  %v652_v62 = vpop.f32.mrf.mxu1 }
 0x160   :  { %v1760_v1 = vadd.f32 %v652_v62, %v427_v61 }
 0x161   :  { %v429_v2 = vpop.f32.mrf.mxu0  ;;  %v654_v3 = vpop.f32.mrf.mxu1 }
 0x163   :  { %v432_v4 = vpop.f32.mrf.mxu0  ;;  %v657_v6 = vpop.f32.mrf.mxu1 }
 0x165   :  { %v434_v7 = vpop.f32.mrf.mxu0  ;;  %v659_v8 = vpop.f32.mrf.mxu1 }
 0x167   :  { %v437_v9 = vpop.f32.mrf.mxu0  ;;  %v662_v0 = vpop.f32.mrf.mxu1 }
 0x169   :  { %v439_v11 = vpop.f32.mrf.mxu0  ;;  %v664_v12 = vpop.f32.mrf.mxu1 }
 0x16b   :  { %v442_v13 = vpop.f32.mrf.mxu0  ;;  %v667_v15 = vpop.f32.mrf.mxu1 }
 0x16d   :  { %v444_v16 = vpop.f32.mrf.mxu0  ;;  %v669_v17 = vpop.f32.mrf.mxu1 }
 0x16f   :  { %v447_v18 = vpop.f32.mrf.mxu0  ;;  %v672_v20 = vpop.f32.mrf.mxu1 }
 0x171   :  { %v449_v21 = vpop.f32.mrf.mxu0  ;;  %v674_v22 = vpop.f32.mrf.mxu1 }
 0x173   :  { %v452_v23 = vpop.f32.mrf.mxu0  ;;  %v677_v25 = vpop.f32.mrf.mxu1 }
 0x175   :  { %v454_v26 = vpop.f32.mrf.mxu0  ;;  %v679_v27 = vpop.f32.mrf.mxu1 }
 0x177   :  { %v457_v28 = vpop.f32.mrf.mxu0  ;;  %v682_v30 = vpop.f32.mrf.mxu1 }
 0x179   :  { %v459_v31 = vpop.f32.mrf.mxu0  ;;  %v684_v32 = vpop.f32.mrf.mxu1 }
 0x17b   :  { %v462_v33 = vpop.f32.mrf.mxu0  ;;  %v687_v35 = vpop.f32.mrf.mxu1 }
 0x17d   :  { %v464_v36 = vpop.f32.mrf.mxu0  ;;  %v689_v37 = vpop.f32.mrf.mxu1 }
 0x17e   :  { %v658_v37 = vadd.f32 %v657_v6, %v432_v4 }
 0x17f   :  { %v467_v38 = vpop.f32.mrf.mxu0  ;;  %v692_v40 = vpop.f32.mrf.mxu1 }
 0x180   :  { %v1774_v4 = vadd.f32 %v692_v40, %v467_v38 }
 0x181   :  { %v469_v41 = vpop.f32.mrf.mxu0  ;;  %v694_v42 = vpop.f32.mrf.mxu1 }
 0x182   :  { %v663_v41 = vadd.f32 %v662_v0, %v437_v9  ;;  %v668_v42 = vadd.f32 %v667_v15, %v442_v13 }
 0x183   :  { %v472_v44 = vpop.f32.mrf.mxu0  ;;  %v697_v46 = vpop.f32.mrf.mxu1 }
 0x184   :  { %v1776_v6 = vadd.f32 %v697_v46, %v472_v44 }
 0x185   :  { %v474_v47 = vpop.f32.mrf.mxu0  ;;  %v699_v49 = vpop.f32.mrf.mxu1 }
 0x186   :  { %v1762_v47 = vadd.f32 %v672_v20, %v447_v18  ;;  %v678_v49 = vadd.f32 %v677_v25, %v452_v23 }
 0x187   :  { %v477_v50 = vpop.f32.mrf.mxu0  ;;  %v702_v52 = vpop.f32.mrf.mxu1 }
 0x188   :  { %v1778_v9 = vadd.f32 %v702_v52, %v477_v50 }
 0x189   :  { %v479_v54 = vpop.f32.mrf.mxu0  ;;  %v704_v55 = vpop.f32.mrf.mxu1 }
 0x18a   :  { %v1767_v55 = vld [vmem:[%s1859_s4] ss:$0 sm:$0xff]  ;;  %s1472_s4 = smov [#allocation7]  }
 0x18b   :  { %v482_v56 = vpop.f32.mrf.mxu0  ;;  %v707_v59 = vpop.f32.mrf.mxu1  ;;  %s1225_s8 = sshll.u32 %s1472_s4, 4  ;;  %s1226_s8 = int_to_ptr.vmem [resolvable:$true] %s1225_s8 }
 0x18c   :  { %v1780_v0 = vadd.f32 %v707_v59, %v482_v56  ;;  %s1439_s9 = scalar_lea.vmem %s1226_s8, 4096  ;;  %p1444_p11 = scmp.lt.s32.totalorder %s1226_s8, %s1226_s8 }
 0x18d   :  { %v484_v60 = vpop.f32.mrf.mxu0  ;;  %v709_v61 = vpop.f32.mrf.mxu1  ;;  %p1440_p10 = scmp.ne.s32.totalorder %s1226_s8, %s1439_s9  ;;  %p1445_p12 = scmp.lt.s32.totalorder %s1439_s9, %s1439_s9 }
 0x18e   :  { %v1769_v61 = vadd.f32 %v682_v30, %v457_v28 }
 0x18f   :  { %v487_v62 = vpop.f32.mrf.mxu0  ;;  %v712_v2 = vpop.f32.mrf.mxu1  ;;  %p1446_p13 = por %p1445_p12, %p1444_p11 }
 0x191   :  { %v489_v3 = vpop.f32.mrf.mxu0  ;;  %v714_v7 = vpop.f32.mrf.mxu1  ;;  %p1447_p0 = pnand %p1446_p13, %p1440_p10 }
 0x192   :  { %v1771_v3 = vadd.f32 %v687_v35, %v462_v33 }
 0x193   :  { %v492_v8 = vpop.f32.mrf.mxu0  ;;  %v717_v11 = vpop.f32.mrf.mxu1 }
 0x194   :  { %v1788_v28 = vadd.f32 %v717_v11, %v492_v8 }
 0x195   :  { %v494_v12 = vpop.f32.mrf.mxu0  ;;  %v719_v16 = vpop.f32.mrf.mxu1 }
 0x197   :  { %v497_v17 = vpop.f32.mrf.mxu0  ;;  %v722_v21 = vpop.f32.mrf.mxu1 }
 0x198   :  { %v1790_v30 = vadd.f32 %v722_v21, %v497_v17 }
 0x199   :  { %v499_v22 = vpop.f32.mrf.mxu0  ;;  %v724_v26 = vpop.f32.mrf.mxu1 }
 0x19b   :  { %v502_v27 = vpop.f32.mrf.mxu0  ;;  %v727_v31 = vpop.f32.mrf.mxu1 }
 0x19c   :  { %v1792_v33 = vadd.f32 %v727_v31, %v502_v27 }
 0x19d   :  { %v504_v32 = vpop.f32.mrf.mxu0  ;;  %v729_v36 = vpop.f32.mrf.mxu1 }
 0x19f   :  { %v1329_v54 = vpop.f32.mrf.mxu0  ;;  %v1353_v60 = vpop.f32.mrf.mxu1 }
 0x1a0   :  { %v900_v7 = vadd.f32 %v1329_v54, %v1730_v48  ;;  %v980_v12 = vadd.f32 %v1353_v60, %v658_v37  ;;  %v1786_v48 = vadd.f32 %v712_v2, %v487_v62 }
 0x1a1   :  { %v894_v13 = vpop.f32.mrf.mxu0  ;;  %v974_v15 = vpop.f32.mrf.mxu1 }
 0x1a2   :  { %v1061_v18 = vadd.f32 %v1767_v55, %v900_v7  ;;  %v1077_v20 = vadd.f32 %v1767_v55, %v980_v12  ;;  %v895_v23 = vadd.f32 %v894_v13, %v1728_v43  ;;  %v975_v25 = vadd.f32 %v974_v15, %v1760_v1 }
 0x1a3   :  { %v1332_v35 = vpop.f32.mrf.mxu0  ;;  %v1356_v38 = vpop.f32.mrf.mxu1 }
 0x1a4   :  { %vm1093_vm1 = vcmp.ge.f32.partialorder %v1061_v18, 0.0  ;;  %v1125_v40 = vmul.f32 0.01, %v1061_v18  ;;  %vm1109_vm2 = vcmp.ge.f32.partialorder %v1077_v20, 0.0  ;;  %v1141_v44 = vmul.f32 0.01, %v1077_v20 }
 0x1a5   :  { %v1060_v46 = vadd.f32 %v1767_v55, %v895_v23  ;;  %v1076_v43 = vadd.f32 %v1767_v55, %v975_v25  ;;  %v910_v1 = vadd.f32 %v1332_v35, %v1734_v58  ;;  %v990_v50 = vadd.f32 %v1356_v38, %v668_v42  ;;  %v904_v52 = vpop.f32.mrf.mxu0  ;;  %v984_v56 = vpop.f32.mrf.mxu1 }
 0x1a6   :  { %v1157_v59 = vsel %vm1093_vm1, %v1061_v18, %v1125_v40  ;;  %v1173_v62 = vsel %vm1109_vm2, %v1077_v20, %v1141_v44  ;;  %v905_v2 = vadd.f32 %v904_v52, %v1732_v53  ;;  %v985_v8 = vadd.f32 %v984_v56, %v663_v41 }
 0x1a7   :  { %1189 = vst [vmem:[#allocation7 + $0x8] sm:$0xff] %v1157_v59  ;;  %1205 = vst [vmem:[#allocation7 + $0x88] sm:$0xff] %v1173_v62  ;;  %vm1092_vm3 = vcmp.ge.f32.partialorder %v1060_v46, 0.0  ;;  %v1124_v11 = vmul.f32 0.01, %v1060_v46  ;;  %vm1108_vm4 = vcmp.ge.f32.partialorder %v1076_v43, 0.0  ;;  %v1335_v17 = vpop.f32.mrf.mxu0  ;;  %v1359_v21 = vpop.f32.mrf.mxu1  ;;  %v1063_v22 = vadd.f32 %v1767_v55, %v910_v1 }
 0x1a8   :  { %v1140_v16 = vmul.f32 0.01, %v1076_v43  ;;  %v1079_v58 = vadd.f32 %v1767_v55, %v990_v50  ;;  %v1062_v26 = vadd.f32 %v1767_v55, %v905_v2  ;;  %v1078_v27 = vadd.f32 %v1767_v55, %v985_v8 }
 0x1a9   :  { %v1156_v31 = vsel %vm1092_vm3, %v1060_v46, %v1124_v11  ;;  %v920_v53 = vadd.f32 %v1335_v17, %v1738_v5  ;;  %v1000_v36 = vadd.f32 %v1359_v21, %v678_v49  ;;  %v914_v37 = vpop.f32.mrf.mxu0  ;;  %v994_v41 = vpop.f32.mrf.mxu1  ;;  %vm1095_vm5 = vcmp.ge.f32.partialorder %v1063_v22, 0.0 }
 0x1aa   :  { %v1172_v32 = vsel %vm1108_vm4, %v1076_v43, %v1140_v16  ;;  %1188 = vst [vmem:[#allocation7] sm:$0xff] %v1156_v31  ;;  %v1127_v42 = vmul.f32 0.01, %v1063_v22  ;;  %vm1111_vm6 = vcmp.ge.f32.partialorder %v1079_v58, 0.0  ;;  %v1143_v54 = vmul.f32 0.01, %v1079_v58 }
 0x1ab   :  { %1204 = vst [vmem:[#allocation7 + $0x80] sm:$0xff] %v1172_v32  ;;  %vm1094_vm7 = vcmp.ge.f32.partialorder %v1062_v26, 0.0  ;;  %v1126_v60 = vmul.f32 0.01, %v1062_v26  ;;  %vm1110_vm8 = vcmp.ge.f32.partialorder %v1078_v27, 0.0  ;;  %v1338_v12 = vpop.f32.mrf.mxu0  ;;  %v1362_v13 = vpop.f32.mrf.mxu1  ;;  %v1065_v20 = vadd.f32 %v1767_v55, %v920_v53 }
 0x1ac   :  { %v1142_v7 = vmul.f32 0.01, %v1078_v27  ;;  %v1159_v15 = vsel %vm1095_vm5, %v1063_v22, %v1127_v42  ;;  %v1175_v18 = vsel %vm1111_vm6, %v1079_v58, %v1143_v54  ;;  %v1081_v5 = vadd.f32 %v1767_v55, %v1000_v36 }
 0x1ad   :  { %1191 = vst [vmem:[#allocation7 + $0x18] sm:$0xff] %v1159_v15  ;;  %1207 = vst [vmem:[#allocation7 + $0x98] sm:$0xff] %v1175_v18  ;;  %v1158_v49 = vsel %vm1094_vm7, %v1062_v26, %v1126_v60  ;;  %v915_v25 = vadd.f32 %v914_v37, %v1736_v63  ;;  %v995_v35 = vadd.f32 %v994_v41, %v1762_v47  ;;  %v924_v38 = vpop.f32.mrf.mxu0  ;;  %v1004_v40 = vpop.f32.mrf.mxu1  ;;  %vm1097_vm9 = vcmp.ge.f32.partialorder %v1065_v20, 0.0 }
 0x1ae   :  { %v1174_v23 = vsel %vm1110_vm8, %v1078_v27, %v1142_v7  ;;  %1190 = vst [vmem:[#allocation7 + $0x10] sm:$0xff] %v1158_v49  ;;  %v1129_v44 = vmul.f32 0.01, %v1065_v20  ;;  %vm1113_vm10 = vcmp.ge.f32.partialorder %v1081_v5, 0.0  ;;  %v1145_v46 = vmul.f32 0.01, %v1081_v5 }
 0x1af   :  { %1206 = vst [vmem:[#allocation7 + $0x90] sm:$0xff] %v1174_v23  ;;  %v1064_v43 = vadd.f32 %v1767_v55, %v915_v25  ;;  %v1080_v1 = vadd.f32 %v1767_v55, %v995_v35  ;;  %v930_v50 = vadd.f32 %v1338_v12, %v1742_v14  ;;  %v1010_v52 = vadd.f32 %v1362_v13, %v1771_v3  ;;  %v1341_v56 = vpop.f32.mrf.mxu0  ;;  %v1365_v63 = vpop.f32.mrf.mxu1 }
 0x1b0   :  { %v1161_v59 = vsel %vm1097_vm9, %v1065_v20, %v1129_v44  ;;  %v1177_v47 = vsel %vm1113_vm10, %v1081_v5, %v1145_v46  ;;  %v925_v62 = vadd.f32 %v924_v38, %v1740_v10  ;;  %v1005_v2 = vadd.f32 %v1004_v40, %v1769_v61 }
 0x1b1   :  { %1193 = vst [vmem:[#allocation7 + $0x28] sm:$0xff] %v1161_v59  ;;  %1209 = vst [vmem:[#allocation7 + $0xa8] sm:$0xff] %v1177_v47  ;;  %vm1096_vm11 = vcmp.ge.f32.partialorder %v1064_v43, 0.0  ;;  %v1128_v8 = vmul.f32 0.01, %v1064_v43  ;;  %vm1112_vm12 = vcmp.ge.f32.partialorder %v1080_v1, 0.0  ;;  %v934_v16 = vpop.f32.mrf.mxu0  ;;  %v1014_v17 = vpop.f32.mrf.mxu1  ;;  %v1067_v14 = vadd.f32 %v1767_v55, %v930_v50 }
 0x1b2   :  { %v1144_v11 = vmul.f32 0.01, %v1080_v1  ;;  %v1083_v3 = vadd.f32 %v1767_v55, %v1010_v52  ;;  %v1066_v21 = vadd.f32 %v1767_v55, %v925_v62  ;;  %v1082_v22 = vadd.f32 %v1767_v55, %v1005_v2 }
 0x1b3   :  { %v1160_v58 = vsel %vm1096_vm11, %v1064_v43, %v1128_v8  ;;  %v940_v61 = vadd.f32 %v1341_v56, %v1746_v24  ;;  %v1020_v26 = vadd.f32 %v1365_v63, %v1776_v6  ;;  %v1344_v27 = vpop.f32.mrf.mxu0  ;;  %v1368_v31 = vpop.f32.mrf.mxu1  ;;  %vm1099_vm13 = vcmp.ge.f32.partialorder %v1067_v14, 0.0 }
 0x1b4   :  { %v1176_v10 = vsel %vm1112_vm12, %v1080_v1, %v1144_v11  ;;  %1192 = vst [vmem:[#allocation7 + $0x20] sm:$0xff] %v1160_v58  ;;  %v1131_v32 = vmul.f32 0.01, %v1067_v14  ;;  %vm1115_vm14 = vcmp.ge.f32.partialorder %v1083_v3, 0.0  ;;  %v1147_v53 = vmul.f32 0.01, %v1083_v3 }
 0x1b5   :  { %1208 = vst [vmem:[#allocation7 + $0xa0] sm:$0xff] %v1176_v10  ;;  %vm1098_vm15 = vcmp.ge.f32.partialorder %v1066_v21, 0.0  ;;  %v1130_v36 = vmul.f32 0.01, %v1066_v21  ;;  %vm1114_vm0 = vcmp.ge.f32.partialorder %v1082_v22, 0.0  ;;  %v944_v41 = vpop.f32.mrf.mxu0  ;;  %v1024_v42 = vpop.f32.mrf.mxu1  ;;  %v1069_v24 = vadd.f32 %v1767_v55, %v940_v61 }
 0x1b6   :  { %v1146_v37 = vmul.f32 0.01, %v1082_v22  ;;  %v1163_v54 = vsel %vm1099_vm13, %v1067_v14, %v1131_v32  ;;  %v1179_v60 = vsel %vm1115_vm14, %v1083_v3, %v1147_v53  ;;  %v1085_v6 = vadd.f32 %v1767_v55, %v1020_v26 }
 0x1b7   :  { %1195 = vst [vmem:[#allocation7 + $0x38] sm:$0xff] %v1163_v54  ;;  %1211 = vst [vmem:[#allocation7 + $0xb8] sm:$0xff] %v1179_v60  ;;  %v1162_v7 = vsel %vm1098_vm15, %v1066_v21, %v1130_v36  ;;  %v935_v13 = vadd.f32 %v934_v16, %v1744_v19  ;;  %v1015_v15 = vadd.f32 %v1014_v17, %v1774_v4  ;;  %v1347_v18 = vpop.f32.mrf.mxu0  ;;  %v1371_v20 = vpop.f32.mrf.mxu1  ;;  %vm1101_vm1 = vcmp.ge.f32.partialorder %v1069_v24, 0.0 }
 0x1b8   :  { %v1178_v12 = vsel %vm1114_vm0, %v1082_v22, %v1146_v37  ;;  %1194 = vst [vmem:[#allocation7 + $0x30] sm:$0xff] %v1162_v7  ;;  %v1133_v5 = vmul.f32 0.01, %v1069_v24  ;;  %vm1117_vm2 = vcmp.ge.f32.partialorder %v1085_v6, 0.0  ;;  %v1149_v49 = vmul.f32 0.01, %v1085_v6 }
 0x1b9   :  { %1210 = vst [vmem:[#allocation7 + $0xb0] sm:$0xff] %v1178_v12  ;;  %v1068_v23 = vadd.f32 %v1767_v55, %v935_v13  ;;  %v1084_v25 = vadd.f32 %v1767_v55, %v1015_v15  ;;  %v950_v35 = vadd.f32 %v1344_v27, %v1750_v34  ;;  %v1030_v38 = vadd.f32 %v1368_v31, %v1780_v0  ;;  %v954_v40 = vpop.f32.mrf.mxu0  ;;  %v1034_v19 = vpop.f32.mrf.mxu1 }
 0x1ba   :  { %v1165_v44 = vsel %vm1101_vm1, %v1069_v24, %v1133_v5  ;;  %v1181_v4 = vsel %vm1117_vm2, %v1085_v6, %v1149_v49  ;;  %v945_v46 = vadd.f32 %v944_v41, %v1748_v29  ;;  %v1025_v43 = vadd.f32 %v1024_v42, %v1778_v9 }
 0x1bb   :  { %1197 = vst [vmem:[#allocation7 + $0x48] sm:$0xff] %v1165_v44  ;;  %1213 = vst [vmem:[#allocation7 + $0xc8] sm:$0xff] %v1181_v4  ;;  %vm1100_vm3 = vcmp.ge.f32.partialorder %v1068_v23, 0.0  ;;  %v1132_v1 = vmul.f32 0.01, %v1068_v23  ;;  %vm1116_vm4 = vcmp.ge.f32.partialorder %v1084_v25, 0.0  ;;  %v1071_v52 = vadd.f32 %v1767_v55, %v950_v35  ;;  %v1350_v47 = vpop.f32.mrf.mxu0  ;;  %v1374_v62 = vpop.f32.mrf.mxu1 }
 0x1bc   :  { %v1148_v50 = vmul.f32 0.01, %v1084_v25  ;;  %v1087_v34 = vadd.f32 %v1767_v55, %v1030_v38  ;;  %v1070_v0 = vadd.f32 %v1767_v55, %v945_v46  ;;  %v1086_v56 = vadd.f32 %v1767_v55, %v1025_v43 }
 0x1bd   :  { %v1164_v63 = vsel %vm1100_vm3, %v1068_v23, %v1132_v1  ;;  %v960_v29 = vadd.f32 %v1347_v18, %v1754_v45  ;;  %v1040_v9 = vadd.f32 %v1371_v20, %v1788_v28  ;;  %vm1103_vm5 = vcmp.ge.f32.partialorder %v1071_v52, 0.0  ;;  %v964_v10 = vpop.f32.mrf.mxu0  ;;  %v1044_v61 = vpop.f32.mrf.mxu1 }
 0x1be   :  { %v1180_v59 = vsel %vm1116_vm4, %v1084_v25, %v1148_v50  ;;  %1196 = vst [vmem:[#allocation7 + $0x40] sm:$0xff] %v1164_v63  ;;  %v1135_v2 = vmul.f32 0.01, %v1071_v52  ;;  %vm1119_vm6 = vcmp.ge.f32.partialorder %v1087_v34, 0.0  ;;  %v1151_v8 = vmul.f32 0.01, %v1087_v34 }
 0x1bf   :  { %1212 = vst [vmem:[#allocation7 + $0xc0] sm:$0xff] %v1180_v59  ;;  %vm1102_vm7 = vcmp.ge.f32.partialorder %v1070_v0, 0.0  ;;  %v1134_v11 = vmul.f32 0.01, %v1070_v0  ;;  %vm1118_vm8 = vcmp.ge.f32.partialorder %v1086_v56, 0.0  ;;  %v1073_v3 = vadd.f32 %v1767_v55, %v960_v29 }
 0x1c0   :  { %v1150_v16 = vmul.f32 0.01, %v1086_v56  ;;  %v1167_v17 = vsel %vm1103_vm5, %v1071_v52, %v1135_v2  ;;  %v1183_v14 = vsel %vm1119_vm6, %v1087_v34, %v1151_v8  ;;  %v1089_v45 = vadd.f32 %v1767_v55, %v1040_v9 }
 0x1c1   :  { %1199 = vst [vmem:[#allocation7 + $0x58] sm:$0xff] %v1167_v17  ;;  %1215 = vst [vmem:[#allocation7 + $0xd8] sm:$0xff] %v1183_v14  ;;  %v1166_v28 = vsel %vm1102_vm7, %v1070_v0, %v1134_v11  ;;  %v955_v22 = vadd.f32 %v954_v40, %v1752_v39  ;;  %v1035_v58 = vadd.f32 %v1034_v19, %v1786_v48  ;;  %vm1105_vm9 = vcmp.ge.f32.partialorder %v1073_v3, 0.0 }
 0x1c2   :  { %v1182_v21 = vsel %vm1118_vm8, %v1086_v56, %v1150_v16  ;;  %1198 = vst [vmem:[#allocation7 + $0x50] sm:$0xff] %v1166_v28  ;;  %v1137_v26 = vmul.f32 0.01, %v1073_v3  ;;  %vm1121_vm10 = vcmp.ge.f32.partialorder %v1089_v45, 0.0  ;;  %v1153_v27 = vmul.f32 0.01, %v1089_v45 }
 0x1c3   :  { %1214 = vst [vmem:[#allocation7 + $0xd0] sm:$0xff] %v1182_v21  ;;  %v1072_v31 = vadd.f32 %v1767_v55, %v955_v22  ;;  %v1088_v32 = vadd.f32 %v1767_v55, %v1035_v58  ;;  %v970_v53 = vadd.f32 %v1350_v47, %v1758_v57  ;;  %v1050_v36 = vadd.f32 %v1374_v62, %v1792_v33 }
 0x1c4   :  { %v1169_v37 = vsel %vm1105_vm9, %v1073_v3, %v1137_v26  ;;  %v1185_v39 = vsel %vm1121_vm10, %v1089_v45, %v1153_v27  ;;  %v965_v48 = vadd.f32 %v964_v10, %v1756_v51  ;;  %v1045_v41 = vadd.f32 %v1044_v61, %v1790_v30 }
 0x1c5   :  { %1201 = vst [vmem:[#allocation7 + $0x68] sm:$0xff] %v1169_v37  ;;  %1217 = vst [vmem:[#allocation7 + $0xe8] sm:$0xff] %v1185_v39  ;;  %vm1104_vm11 = vcmp.ge.f32.partialorder %v1072_v31, 0.0  ;;  %v1136_v42 = vmul.f32 0.01, %v1072_v31  ;;  %vm1120_vm12 = vcmp.ge.f32.partialorder %v1088_v32, 0.0  ;;  %v1075_v60 = vadd.f32 %v1767_v55, %v970_v53 }
 0x1c6   :  { %v1152_v54 = vmul.f32 0.01, %v1088_v32  ;;  %v1091_v24 = vadd.f32 %v1767_v55, %v1050_v36  ;;  %v1074_v57 = vadd.f32 %v1767_v55, %v965_v48  ;;  %v1090_v33 = vadd.f32 %v1767_v55, %v1045_v41 }
 0x1c7   :  { %v1168_v6 = vsel %vm1104_vm11, %v1072_v31, %v1136_v42  ;;  %vm1107_vm13 = vcmp.ge.f32.partialorder %v1075_v60, 0.0  ;;  %v1139_v51 = vmul.f32 0.01, %v1075_v60 }
 0x1c8   :  { %v1184_v7 = vsel %vm1120_vm12, %v1088_v32, %v1152_v54  ;;  %1200 = vst [vmem:[#allocation7 + $0x60] sm:$0xff] %v1168_v6  ;;  %vm1123_vm14 = vcmp.ge.f32.partialorder %v1091_v24, 0.0  ;;  %v1155_v30 = vmul.f32 0.01, %v1091_v24  ;;  %vm1106_vm15 = vcmp.ge.f32.partialorder %v1074_v57, 0.0 }
 0x1c9   :  { %1216 = vst [vmem:[#allocation7 + $0xe0] sm:$0xff] %v1184_v7  ;;  %v1138_v12 = vmul.f32 0.01, %v1074_v57  ;;  %vm1122_vm0 = vcmp.ge.f32.partialorder %v1090_v33, 0.0  ;;  %v1154_v13 = vmul.f32 0.01, %v1090_v33  ;;  %v1171_v15 = vsel %vm1107_vm13, %v1075_v60, %v1139_v51 }
 0x1ca   :  { %v1187_v18 = vsel %vm1123_vm14, %v1091_v24, %v1155_v30  ;;  %1203 = vst [vmem:[#allocation7 + $0x78] sm:$0xff] %v1171_v15 }
 0x1cb   :  { %1219 = vst [vmem:[#allocation7 + $0xf8] sm:$0xff] %v1187_v18  ;;  %v1170_v55 = vsel %vm1106_vm15, %v1074_v57, %v1138_v12  ;;  %v1186_v20 = vsel %vm1122_vm0, %v1090_v33, %v1154_v13 }
 0x1cc   :  { %1202 = vst [vmem:[#allocation7 + $0x70] sm:$0xff] %v1170_v55  ;;  %1218 = vst [vmem:[#allocation7 + $0xf0] sm:$0xff] %v1186_v20 }
 0x1cd   :  { %1450 = shalt.err (!%p1447_p0)
}
 0x1ce   :  { %1231 = dma.vmem_to_hbm [thread:$0]  %s1226_s8, 4096, %s1860_s5, [#allocation4], %s1469_s28, %s1469_s28, %s1470_s29  }
 0x1cf   :  { %1463 = dma.done.wait [#allocation4], 4096  }
 0x1d0   :  { %1464 = vsyncadd [#allocation4], 4294963200 }
 0x1d1   :  { %1235 = vsyncpa [#allocation3], 1 }
 0x1d2   :  { %1236 = vsyncpa [#allocation6], 1 }
 0x1d3   :  { %1237 = vsyncpa [#allocation4], 1 }

</bundles_post_ra>
